<compile_context>
chip_gen: v7x
topology: tpu7x:2x2x1
jax: 0.10.0
libtpu: 0.0.40
codegen_flags: <defaults>
</compile_context>

<pallas_src>
import functools

import numpy as np
import jax
import jax.numpy as jnp
from jax.experimental import pallas as pl
from jax.experimental.pallas import tpu as pltpu


def _round_up(v, m):
    return -(-v // m) * m


# ---------------------------------------------------------------------------
# Pallas kernel: multi-tap stride-1 conv as shifted-slab GEMMs + bias + PReLU
# (+ optional fused residual add).
# ---------------------------------------------------------------------------
def _tap_conv_kernel(x_ref, w_ref, b_ref, a_ref, *rest, shifts, m, has_res):
    # x_ref : (L, Ci)        flat padded activation slab (one image)
    # w_ref : (T*T, Ci, Co)  per-tap weight matrices (Co padded to 128-lane)
    # b_ref : (1, Co)        bias (f32)
    # a_ref : (1, 1) SMEM    PReLU slope
    # rest  : [res_ref (M, Co)], o_ref (M, Co)
    if has_res:
        res_ref, o_ref = rest
    else:
        (o_ref,) = rest
    cop = o_ref.shape[-1]
    acc = jnp.zeros((m, cop), jnp.float32)
    # Taps are unrolled: each is one (M, Ci) x (Ci, Co) MXU matmul, f32 accumulate.
    for t, sh in enumerate(shifts):
        acc = acc + jnp.dot(x_ref[sh:sh + m, :], w_ref[t],
                            preferred_element_type=jnp.float32)
    acc = acc + b_ref[...]
    alpha = a_ref[0, 0]
    acc = jnp.where(acc > 0, acc, alpha * acc)
    if has_res:
        acc = acc + res_ref[...]       # fused `l1 + l0`
    o_ref[...] = acc.astype(o_ref.dtype)


def _tap_conv_pallas(xs, w_taps, bias_vec, alpha, taps, Ho, Wo, compute_dtype,
                     residual_raw=None):
    """xs: (N, Hi, Wi, Ci) already spatially padded.  w_taps: (taps*taps, Ci, Co).
    Returns (raw (N, Ho*Wi, Co_pad) f32, out (N, Ho, Wo, Co) f32)."""
    N, Hi, Wi, Ci = xs.shape
    nt, Ci2, Co = w_taps.shape
    assert nt == taps * taps and Ci2 == Ci
    Co_pad = _round_up(Co, 128)                     # lane-dense output
    M = Ho * Wi                                     # output rows (garbage cols sliced later)
    shifts = tuple(th * Wi + tw for th in range(taps) for tw in range(taps))
    L = Hi * Wi
    extra = max(0, (Ho + taps - 1 - Hi) * Wi + (taps - 1))
    x_flat = xs.reshape(N, L, Ci)
    if extra:
        x_flat = jnp.pad(x_flat, ((0, 0), (0, extra), (0, 0)))
        L += extra
    x_flat = x_flat.astype(compute_dtype)           # bf16 MXU operands
    wq = w_taps.astype(compute_dtype)
    if Co_pad != Co:
        wq = jnp.pad(wq, ((0, 0), (0, 0), (0, Co_pad - Co)))
    b2 = jnp.pad(bias_vec.astype(jnp.float32), (0, Co_pad - Co)).reshape(1, Co_pad)
    a2 = jnp.asarray(alpha, jnp.float32).reshape(1, 1)

    kernel = functools.partial(_tap_conv_kernel, shifts=shifts, m=M,
                               has_res=residual_raw is not None)
    in_specs = [
        pl.BlockSpec((None, L, Ci), lambda n: (n, 0, 0)),
        pl.BlockSpec((nt, Ci, Co_pad), lambda n: (0, 0, 0)),
        pl.BlockSpec((1, Co_pad), lambda n: (0, 0)),
        pl.BlockSpec(memory_space=pltpu.MemorySpace.SMEM),
    ]
    args = [x_flat, wq, b2, a2]
    if residual_raw is not None:
        assert residual_raw.shape == (N, M, Co_pad), residual_raw.shape
        in_specs.append(pl.BlockSpec((None, M, Co_pad), lambda n: (n, 0, 0)))
        args.append(residual_raw)

    raw = pl.pallas_call(
        kernel,
        out_shape=jax.ShapeDtypeStruct((N, M, Co_pad), jnp.float32),
        grid=(N,),
        in_specs=in_specs,
        out_specs=pl.BlockSpec((None, M, Co_pad), lambda n: (n, 0, 0)),
        compiler_params=pltpu.CompilerParams(dimension_semantics=("parallel",)),
    )(*args)

    out = raw.reshape(N, Ho, Wi, Co_pad)[:, :, :Wo, :Co]
    return raw, out


# ---------------------------------------------------------------------------
# JAX glue: layout prepasses (fused by XLA) + weight re-arrangements
# ---------------------------------------------------------------------------
def _space_to_depth(x, s):
    if s == 1:
        return x
    N, H, W, C = x.shape
    x = x.reshape(N, H // s, s, W // s, s, C).transpose(0, 1, 3, 2, 4, 5)
    return x.reshape(N, H // s, W // s, s * s * C)


def _conv_tap_weight(w, k, s):
    # w: (Co, Ci, k, k) torch Conv2d layout -> (T*T, s*s*Ci, Co), T = k // s
    Co, Ci = w.shape[0], w.shape[1]
    T = k // s
    w6 = w.reshape(Co, Ci, T, s, T, s)
    w6 = jnp.transpose(w6, (2, 4, 3, 5, 1, 0))      # (th, tw, ry, rx, Ci, Co)
    return w6.reshape(T * T, s * s * Ci, Co)


def _deconv_tap_weight(w, k, s, p):
    # w: (Ci, Co, k, k) torch ConvTranspose2d layout.
    # Sub-pixel decomposition: (U, U) taps over the original input, output
    # channels are all s*s phases.  Zero entries for (phase, tap) combos that
    # do not contribute.
    Ci, Co = w.shape[0], w.shape[1]
    T = k // s
    d = [(r + p) // s for r in range(s)]
    dmin, dmax = min(d), max(d)
    U = T + dmax - dmin
    pad_lo = (T - 1) - dmin
    a_idx = np.full((U, s), -1, dtype=np.int64)
    for r in range(s):
        for u in range(U):
            j = d[r] + pad_lo - u
            if 0 <= j < T:
                a_idx[u, r] = (j - d[r]) * s + r + p
    Ah = a_idx[:, None, :, None]                    # (U, 1, s, 1)
    Aw = a_idx[None, :, None, :]                    # (1, U, 1, s)
    valid = (Ah >= 0) & (Aw >= 0)                   # (U, U, s, s)
    g = w[:, :, np.maximum(Ah, 0), np.maximum(Aw, 0)]          # (Ci, Co, U, U, s, s)
    g = jnp.where(jnp.asarray(valid)[None, None], g, 0.0)
    g = jnp.transpose(g, (2, 3, 0, 4, 5, 1))        # (U, U, Ci, r_h, r_w, Co)
    return g.reshape(U * U, Ci, s * s * Co), U, pad_lo, dmax


def conv_prelu_block(x, w, b, alpha, k, s, p, compute_dtype, residual_raw=None):
    # x: NHWC f32; w: (Co, Ci, k, k) torch Conv2d layout.
    N, H, W, _ = x.shape
    assert k % s == 0, "TODO(synk): kernel_size % stride != 0 not supported"
    T = k // s
    Hp, Wp = H + 2 * p, W + 2 * p
    Ho = (Hp - k) // s + 1
    Wo = (Wp - k) // s + 1
    Hp2, Wp2 = _round_up(Hp, s), _round_up(Wp, s)
    xp = jnp.pad(x, ((0, 0), (p, p + Hp2 - Hp), (p, p + Wp2 - Wp), (0, 0)))
    xs = _space_to_depth(xp, s)                     # (N, Hp2/s, Wp2/s, s*s*Ci)
    w_taps = _conv_tap_weight(w, k, s)
    return _tap_conv_pallas(xs, w_taps, b, alpha, T, Ho, Wo, compute_dtype,
                            residual_raw=residual_raw)


def deconv_prelu_block(x, w, b, alpha, k, s, p, compute_dtype):
    # x: NHWC f32; w: (Ci, Co, k, k) torch ConvTranspose2d layout.
    N, H, W, _ = x.shape
    Co = w.shape[1]
    assert k % s == 0, "TODO(synk): kernel_size % stride != 0 not supported"
    Ho_out = (H - 1) * s - 2 * p + k
    Wo_out = (W - 1) * s - 2 * p + k
    assert Ho_out % s == 0 and Wo_out % s == 0, "TODO(synk): (k-2p) % s != 0 not supported"
    Hb, Wb = Ho_out // s, Wo_out // s
    w_taps, U, pad_lo, dmax = _deconv_tap_weight(w, k, s, p)
    assert pad_lo >= 0, "TODO(synk): padding >= kernel - stride not supported"
    pad_hi_h = max(0, (Hb - 1) + dmax - (H - 1))
    pad_hi_w = max(0, (Wb - 1) + dmax - (W - 1))
    xp = jnp.pad(x, ((0, 0), (pad_lo, pad_hi_h), (pad_lo, pad_hi_w), (0, 0)))
    bias_tiled = jnp.tile(b, s * s)                 # per (r_h, r_w, co)
    _, y = _tap_conv_pallas(xp, w_taps, bias_tiled, alpha, U, Hb, Wb, compute_dtype)
    # depth-to-space: (N, Hb, Wb, s*s*Co) -> (N, Hb*s, Wb*s, Co)
    y = y.reshape(N, Hb, Wb, s, s, Co).transpose(0, 1, 3, 2, 4, 5)
    return y.reshape(N, Hb * s, Wb * s, Co)


# ---------------------------------------------------------------------------
# D_DownBlock forward
# ---------------------------------------------------------------------------
def d_down_block(x_nchw, params, k=8, stride=4, pad=2, compute_dtype=jnp.bfloat16):
    x = jnp.transpose(x_nchw, (0, 2, 3, 1))         # NHWC internal layout
    _, x1 = conv_prelu_block(x, params["conv_w"], params["conv_b"], params["conv_a"],
                             1, 1, 0, compute_dtype)
    l0_raw, l0 = conv_prelu_block(x1, params["dc1_w"], params["dc1_b"], params["dc1_a"],
                                  k, stride, pad, compute_dtype)
    h0 = deconv_prelu_block(l0, params["dc2_w"], params["dc2_b"], params["dc2_a"],
                            k, stride, pad, compute_dtype)
    # `h0 - x1` fuses into dc3's pad/space-to-depth prepass under jit;
    # `l1 + l0` is fused inside the dc3 Pallas kernel via the residual ref.
    _, out = conv_prelu_block(h0 - x1, params["dc3_w"], params["dc3_b"], params["dc3_a"],
                              k, stride, pad, compute_dtype, residual_raw=l0_raw)
    return jnp.transpose(out, (0, 3, 1, 2))         # back to NCHW


def init_params(key, num_filter, num_stages, k):
    ks = jax.random.split(key, 8)
    s = 0.05
    return {
        "conv_w": s * jax.random.normal(ks[0], (num_filter, num_filter * num_stages, 1, 1), jnp.float32),
        "conv_b": s * jax.random.normal(ks[1], (num_filter,), jnp.float32),
        "conv_a": jnp.float32(0.25),
        "dc1_w": s * jax.random.normal(ks[2], (num_filter, num_filter, k, k), jnp.float32),
        "dc1_b": s * jax.random.normal(ks[3], (num_filter,), jnp.float32),
        "dc1_a": jnp.float32(0.25),
        # ConvTranspose2d weight layout: (Cin, Cout, k, k)
        "dc2_w": s * jax.random.normal(ks[4], (num_filter, num_filter, k, k), jnp.float32),
        "dc2_b": s * jax.random.normal(ks[5], (num_filter,), jnp.float32),
        "dc2_a": jnp.float32(0.25),
        "dc3_w": s * jax.random.normal(ks[6], (num_filter, num_filter, k, k), jnp.float32),
        "dc3_b": s * jax.random.normal(ks[7], (num_filter,), jnp.float32),
        "dc3_a": jnp.float32(0.25),
    }


# ---------------------------------------------------------------------------
# Pure-JAX (lax.conv) reference for correctness checking
# ---------------------------------------------------------------------------
def _ref_conv(x, w, b, a, s, p):
    y = jax.lax.conv_general_dilated(x, w, (s, s), [(p, p), (p, p)],
                                     dimension_numbers=("NCHW", "OIHW", "NCHW"))
    y = y + b[None, :, None, None]
    return jnp.where(y > 0, y, a * y)


def _ref_deconv(x, w, b, a, s, p, k):
    w_conv = jnp.flip(w, axis=(2, 3)).transpose(1, 0, 2, 3)
    y = jax.lax.conv_general_dilated(x, w_conv, (1, 1), [(k - 1 - p,) * 2] * 2,
                                     lhs_dilation=(s, s),
                                     dimension_numbers=("NCHW", "OIHW", "NCHW"))
    y = y + b[None, :, None, None]
    return jnp.where(y > 0, y, a * y)


def d_down_block_ref(x, p, k=8, stride=4, pad=2):
    x = _ref_conv(x, p["conv_w"], p["conv_b"], p["conv_a"], 1, 0)
    l0 = _ref_conv(x, p["dc1_w"], p["dc1_b"], p["dc1_a"], stride, pad)
    h0 = _ref_deconv(l0, p["dc2_w"], p["dc2_b"], p["dc2_a"], stride, pad, k)
    l1 = _ref_conv(h0 - x, p["dc3_w"], p["dc3_b"], p["dc3_a"], stride, pad)
    return l1 + l0


if __name__ == "__main__":
    num_filter, num_stages = 4, 1
    N, H, W = 2, 16, 16
    k, stride, pad = 8, 4, 2

    key = jax.random.PRNGKey(0)
    kx, kp = jax.random.split(key)
    x = jax.random.normal(kx, (N, num_filter * num_stages, H, W), jnp.float32)
    params = init_params(kp, num_filter, num_stages, k)

    ref = d_down_block_ref(x, params, k=k, stride=stride, pad=pad)

    # f32 operand path: tight check against the lax reference.
    fwd_f32 = jax.jit(functools.partial(d_down_block, k=k, stride=stride, pad=pad,
                                        compute_dtype=jnp.float32))
    out_f32 = fwd_f32(x, params)
    jax.block_until_ready(out_f32)
    assert out_f32.shape == (N, num_filter, H // stride, W // stride), out_f32.shape
    err_f32 = float(jnp.max(jnp.abs(out_f32 - ref)))
    assert err_f32 < 1e-3, err_f32

    # bf16 MXU operand path (default / fast): loose sanity check.
    fwd_bf16 = jax.jit(functools.partial(d_down_block, k=k, stride=stride, pad=pad,
                                         compute_dtype=jnp.bfloat16))
    out_bf16 = fwd_bf16(x, params)
    jax.block_until_ready(out_bf16)
    assert bool(jnp.all(jnp.isfinite(out_bf16)))
    err_bf16 = float(jnp.max(jnp.abs(out_bf16 - ref)))
    assert err_bf16 < 0.1, err_bf16

    print("KERNEL_OK")
</pallas_src>

<mosaic_0001>
module attributes {stable_mosaic.version = 11 : i64} {
  func.func @_tap_conv_kernel(%arg0: i32, %arg1: memref<1x256x4xf32, #tpu.memory_space<vmem>>, %arg2: memref<1x4x128xf32, #tpu.memory_space<vmem>>, %arg3: memref<1x128xf32, #tpu.memory_space<vmem>>, %arg4: memref<1x1xf32, #tpu.memory_space<smem>>, %arg5: memref<1x256x128xf32, #tpu.memory_space<vmem>>) attributes {dimension_semantics = [#tpu.dimension_semantics<parallel>], iteration_bounds = array<i64: 2>, scalar_prefetch = 0 : i64, scratch_operands = 0 : i64, tpu.core_type = #tpu.core_type<tc>, window_params = [{transform_indices = @transform_0, window_bounds = array<i64: 1, 256, 4>}, {pipeline_mode = #tpu.pipeline_mode<synchronous>, transform_indices = @transform_1, window_bounds = array<i64: 1, 4, 128>}, {pipeline_mode = #tpu.pipeline_mode<synchronous>, transform_indices = @transform_2, window_bounds = array<i64: 1, 128>}, {transform_indices = @transform_3, window_bounds = array<i64: 1, 1>}, {transform_indices = @transform_4, window_bounds = array<i64: 1, 256, 128>}]} {
    %cst = arith.constant 0.000000e+00 : f32
    %0 = vector.broadcast %cst : f32 to vector<256x128xf32>
    %c0 = arith.constant 0 : index
    %c0_0 = arith.constant 0 : index
    %c0_1 = arith.constant 0 : index
    %1 = vector.load %arg1[%c0, %c0_0, %c0_1] : memref<1x256x4xf32, #tpu.memory_space<vmem>>, vector<1x256x4xf32>
    %2 = vector.shape_cast %1 : vector<1x256x4xf32> to vector<256x4xf32>
    %c0_2 = arith.constant 0 : index
    %c0_3 = arith.constant 0 : index
    %c0_4 = arith.constant 0 : index
    %3 = vector.load %arg2[%c0_2, %c0_3, %c0_4] : memref<1x4x128xf32, #tpu.memory_space<vmem>>, vector<1x4x128xf32>
    %4 = vector.shape_cast %3 : vector<1x4x128xf32> to vector<4x128xf32>
    %cst_5 = arith.constant dense<0.000000e+00> : vector<256x128xf32>
    %5 = tpu.matmul %2, %4, %cst_5 {dimension_numbers = #tpu.dot_dimension_numbers<[1], [0], [0], [1], [0, 0, 1, 1], [], []>} : vector<256x4xf32>, vector<4x128xf32>, vector<256x128xf32> -> vector<256x128xf32>
    %6 = arith.addf %0, %5 : vector<256x128xf32>
    %c0_6 = arith.constant 0 : index
    %c0_7 = arith.constant 0 : index
    %7 = vector.load %arg3[%c0_6, %c0_7] : memref<1x128xf32, #tpu.memory_space<vmem>>, vector<1x128xf32>
    %8 = vector.broadcast %7 : vector<1x128xf32> to vector<256x128xf32>
    %9 = arith.addf %6, %8 : vector<256x128xf32>
    %c0_8 = arith.constant 0 : index
    %c0_9 = arith.constant 0 : index
    %10 = memref.load %arg4[%c0_8, %c0_9] : memref<1x1xf32, #tpu.memory_space<smem>>
    %cst_10 = arith.constant 0.000000e+00 : f32
    %11 = vector.broadcast %cst_10 : f32 to vector<256x128xf32>
    %12 = arith.cmpf ogt, %9, %11 : vector<256x128xf32>
    %13 = vector.broadcast %10 : f32 to vector<256x128xf32>
    %14 = arith.mulf %13, %9 : vector<256x128xf32>
    %15 = arith.select %12, %9, %14 : vector<256x128xi1>, vector<256x128xf32>
    %c0_11 = arith.constant 0 : index
    %c0_12 = arith.constant 0 : index
    %c0_13 = arith.constant 0 : index
    %16 = vector.load %arg5[%c0_11, %c0_12, %c0_13] : memref<1x256x128xf32, #tpu.memory_space<vmem>>, vector<1x256x128xf32>
    %17 = vector.shape_cast %16 : vector<1x256x128xf32> to vector<256x128xf32>
    %18 = vector.shape_cast %15 : vector<256x128xf32> to vector<1x256x128xf32>
    tpu.vector_store %arg5[%c0_11, %c0_12, %c0_13], %18 {strides = array<i32>} : memref<1x256x128xf32, #tpu.memory_space<vmem>>, vector<1x256x128xf32>,
    return
  }
  func.func @transform_0(%arg0: i32) -> (i32, i32, i32) {
    %c0_i32 = arith.constant 0 : i32
    %c0_i32_0 = arith.constant 0 : i32
    %c0_i32_1 = arith.constant 0 : i32
    return %arg0, %c0_i32, %c0_i32_0 : i32, i32, i32
  }
  func.func @transform_1(%arg0: i32) -> (i32, i32, i32) {
    %c0_i32 = arith.constant 0 : i32
    %c0_i32_0 = arith.constant 0 : i32
    %c0_i32_1 = arith.constant 0 : i32
    %c0_i32_2 = arith.constant 0 : i32
    return %c0_i32, %c0_i32_0, %c0_i32_1 : i32, i32, i32
  }
  func.func @transform_2(%arg0: i32) -> (i32, i32) {
    %c0_i32 = arith.constant 0 : i32
    %c0_i32_0 = arith.constant 0 : i32
    %c0_i32_1 = arith.constant 0 : i32
    return %c0_i32, %c0_i32_0 : i32, i32
  }
  func.func @transform_3(%arg0: i32) -> (i32, i32) {
    %c0_i32 = arith.constant 0 : i32
    %c0_i32_0 = arith.constant 0 : i32
    %c0_i32_1 = arith.constant 0 : i32
    return %c0_i32, %c0_i32_0 : i32, i32
  }
  func.func @transform_4(%arg0: i32) -> (i32, i32, i32) {
    %c0_i32 = arith.constant 0 : i32
    %c0_i32_0 = arith.constant 0 : i32
    %c0_i32_1 = arith.constant 0 : i32
    return %arg0, %c0_i32, %c0_i32_0 : i32, i32, i32
  }
}

module attributes {stable_mosaic.version = 11 : i64} {
  func.func @_tap_conv_kernel(%arg0: i32, %arg1: memref<1x26x64xf32, #tpu.memory_space<vmem>>, %arg2: memref<4x64x128xf32, #tpu.memory_space<vmem>>, %arg3: memref<1x128xf32, #tpu.memory_space<vmem>>, %arg4: memref<1x1xf32, #tpu.memory_space<smem>>, %arg5: memref<1x20x128xf32, #tpu.memory_space<vmem>>) attributes {dimension_semantics = [#tpu.dimension_semantics<parallel>], iteration_bounds = array<i64: 2>, scalar_prefetch = 0 : i64, scratch_operands = 0 : i64, tpu.core_type = #tpu.core_type<tc>, window_params = [{transform_indices = @transform_0, window_bounds = array<i64: 1, 26, 64>}, {pipeline_mode = #tpu.pipeline_mode<synchronous>, transform_indices = @transform_1, window_bounds = array<i64: 4, 64, 128>}, {pipeline_mode = #tpu.pipeline_mode<synchronous>, transform_indices = @transform_2, window_bounds = array<i64: 1, 128>}, {transform_indices = @transform_3, window_bounds = array<i64: 1, 1>}, {transform_indices = @transform_4, window_bounds = array<i64: 1, 20, 128>}]} {
    %cst = arith.constant 0.000000e+00 : f32
    %0 = vector.broadcast %cst : f32 to vector<20x128xf32>
    %c0 = arith.constant 0 : index
    %c0_0 = arith.constant 0 : index
    %c0_1 = arith.constant 0 : index
    %1 = vector.load %arg1[%c0, %c0_0, %c0_1] : memref<1x26x64xf32, #tpu.memory_space<vmem>>, vector<1x20x64xf32>
    %2 = vector.shape_cast %1 : vector<1x20x64xf32> to vector<20x64xf32>
    %c0_2 = arith.constant 0 : index
    %c0_3 = arith.constant 0 : index
    %c0_4 = arith.constant 0 : index
    %3 = vector.load %arg2[%c0_2, %c0_3, %c0_4] : memref<4x64x128xf32, #tpu.memory_space<vmem>>, vector<1x64x128xf32>
    %4 = vector.shape_cast %3 : vector<1x64x128xf32> to vector<64x128xf32>
    %cst_5 = arith.constant dense<0.000000e+00> : vector<20x128xf32>
    %5 = tpu.matmul %2, %4, %cst_5 {dimension_numbers = #tpu.dot_dimension_numbers<[1], [0], [0], [1], [0, 0, 1, 1], [], []>} : vector<20x64xf32>, vector<64x128xf32>, vector<20x128xf32> -> vector<20x128xf32>
    %6 = arith.addf %0, %5 : vector<20x128xf32>
    %c0_6 = arith.constant 0 : index
    %c1 = arith.constant 1 : index
    %c0_7 = arith.constant 0 : index
    %7 = vector.load %arg1[%c0_6, %c1, %c0_7] : memref<1x26x64xf32, #tpu.memory_space<vmem>>, vector<1x20x64xf32>
    %8 = vector.shape_cast %7 : vector<1x20x64xf32> to vector<20x64xf32>
    %c1_8 = arith.constant 1 : index
    %c0_9 = arith.constant 0 : index
    %c0_10 = arith.constant 0 : index
    %9 = vector.load %arg2[%c1_8, %c0_9, %c0_10] : memref<4x64x128xf32, #tpu.memory_space<vmem>>, vector<1x64x128xf32>
    %10 = vector.shape_cast %9 : vector<1x64x128xf32> to vector<64x128xf32>
    %cst_11 = arith.constant dense<0.000000e+00> : vector<20x128xf32>
    %11 = tpu.matmul %8, %10, %cst_11 {dimension_numbers = #tpu.dot_dimension_numbers<[1], [0], [0], [1], [0, 0, 1, 1], [], []>} : vector<20x64xf32>, vector<64x128xf32>, vector<20x128xf32> -> vector<20x128xf32>
    %12 = arith.addf %6, %11 : vector<20x128xf32>
    %c0_12 = arith.constant 0 : index
    %c5 = arith.constant 5 : index
    %c0_13 = arith.constant 0 : index
    %13 = vector.load %arg1[%c0_12, %c5, %c0_13] : memref<1x26x64xf32, #tpu.memory_space<vmem>>, vector<1x20x64xf32>
    %14 = vector.shape_cast %13 : vector<1x20x64xf32> to vector<20x64xf32>
    %c2 = arith.constant 2 : index
    %c0_14 = arith.constant 0 : index
    %c0_15 = arith.constant 0 : index
    %15 = vector.load %arg2[%c2, %c0_14, %c0_15] : memref<4x64x128xf32, #tpu.memory_space<vmem>>, vector<1x64x128xf32>
    %16 = vector.shape_cast %15 : vector<1x64x128xf32> to vector<64x128xf32>
    %cst_16 = arith.constant dense<0.000000e+00> : vector<20x128xf32>
    %17 = tpu.matmul %14, %16, %cst_16 {dimension_numbers = #tpu.dot_dimension_numbers<[1], [0], [0], [1], [0, 0, 1, 1], [], []>} : vector<20x64xf32>, vector<64x128xf32>, vector<20x128xf32> -> vector<20x128xf32>
    %18 = arith.addf %12, %17 : vector<20x128xf32>
    %c0_17 = arith.constant 0 : index
    %c6 = arith.constant 6 : index
    %c0_18 = arith.constant 0 : index
    %19 = vector.load %arg1[%c0_17, %c6, %c0_18] : memref<1x26x64xf32, #tpu.memory_space<vmem>>, vector<1x20x64xf32>
    %20 = vector.shape_cast %19 : vector<1x20x64xf32> to vector<20x64xf32>
    %c3 = arith.constant 3 : index
    %c0_19 = arith.constant 0 : index
    %c0_20 = arith.constant 0 : index
    %21 = vector.load %arg2[%c3, %c0_19, %c0_20] : memref<4x64x128xf32, #tpu.memory_space<vmem>>, vector<1x64x128xf32>
    %22 = vector.shape_cast %21 : vector<1x64x128xf32> to vector<64x128xf32>
    %cst_21 = arith.constant dense<0.000000e+00> : vector<20x128xf32>
    %23 = tpu.matmul %20, %22, %cst_21 {dimension_numbers = #tpu.dot_dimension_numbers<[1], [0], [0], [1], [0, 0, 1, 1], [], []>} : vector<20x64xf32>, vector<64x128xf32>, vector<20x128xf32> -> vector<20x128xf32>
    %24 = arith.addf %18, %23 : vector<20x128xf32>
    %c0_22 = arith.constant 0 : index
    %c0_23 = arith.constant 0 : index
    %25 = vector.load %arg3[%c0_22, %c0_23] : memref<1x128xf32, #tpu.memory_space<vmem>>, vector<1x128xf32>
    %26 = vector.broadcast %25 : vector<1x128xf32> to vector<20x128xf32>
    %27 = arith.addf %24, %26 : vector<20x128xf32>
    %c0_24 = arith.constant 0 : index
    %c0_25 = arith.constant 0 : index
    %28 = memref.load %arg4[%c0_24, %c0_25] : memref<1x1xf32, #tpu.memory_space<smem>>
    %cst_26 = arith.constant 0.000000e+00 : f32
    %29 = vector.broadcast %cst_26 : f32 to vector<20x128xf32>
    %30 = arith.cmpf ogt, %27, %29 : vector<20x128xf32>
    %31 = vector.broadcast %28 : f32 to vector<20x128xf32>
    %32 = arith.mulf %31, %27 : vector<20x128xf32>
    %33 = arith.select %30, %27, %32 : vector<20x128xi1>, vector<20x128xf32>
    %c0_27 = arith.constant 0 : index
    %c0_28 = arith.constant 0 : index
    %c0_29 = arith.constant 0 : index
    %34 = vector.load %arg5[%c0_27, %c0_28, %c0_29] : memref<1x20x128xf32, #tpu.memory_space<vmem>>, vector<1x20x128xf32>
    %35 = vector.shape_cast %34 : vector<1x20x128xf32> to vector<20x128xf32>
    %36 = vector.shape_cast %33 : vector<20x128xf32> to vector<1x20x128xf32>
    tpu.vector_store %arg5[%c0_27, %c0_28, %c0_29], %36 {strides = array<i32>} : memref<1x20x128xf32, #tpu.memory_space<vmem>>, vector<1x20x128xf32>,
    return
  }
  func.func @transform_0(%arg0: i32) -> (i32, i32, i32) {
    %c0_i32 = arith.constant 0 : i32
    %c0_i32_0 = arith.constant 0 : i32
    %c0_i32_1 = arith.constant 0 : i32
    return %arg0, %c0_i32, %c0_i32_0 : i32, i32, i32
  }
  func.func @transform_1(%arg0: i32) -> (i32, i32, i32) {
    %c0_i32 = arith.constant 0 : i32
    %c0_i32_0 = arith.constant 0 : i32
    %c0_i32_1 = arith.constant 0 : i32
    %c0_i32_2 = arith.constant 0 : i32
    return %c0_i32, %c0_i32_0, %c0_i32_1 : i32, i32, i32
  }
  func.func @transform_2(%arg0: i32) -> (i32, i32) {
    %c0_i32 = arith.constant 0 : i32
    %c0_i32_0 = arith.constant 0 : i32
    %c0_i32_1 = arith.constant 0 : i32
    return %c0_i32, %c0_i32_0 : i32, i32
  }
  func.func @transform_3(%arg0: i32) -> (i32, i32) {
    %c0_i32 = arith.constant 0 : i32
    %c0_i32_0 = arith.constant 0 : i32
    %c0_i32_1 = arith.constant 0 : i32
    return %c0_i32, %c0_i32_0 : i32, i32
  }
  func.func @transform_4(%arg0: i32) -> (i32, i32, i32) {
    %c0_i32 = arith.constant 0 : i32
    %c0_i32_0 = arith.constant 0 : i32
    %c0_i32_1 = arith.constant 0 : i32
    return %arg0, %c0_i32, %c0_i32_0 : i32, i32, i32
  }
}

module attributes {stable_mosaic.version = 11 : i64} {
  func.func @_tap_conv_kernel(%arg0: i32, %arg1: memref<1x38x4xf32, #tpu.memory_space<vmem>>, %arg2: memref<9x4x128xf32, #tpu.memory_space<vmem>>, %arg3: memref<1x128xf32, #tpu.memory_space<vmem>>, %arg4: memref<1x1xf32, #tpu.memory_space<smem>>, %arg5: memref<1x24x128xf32, #tpu.memory_space<vmem>>) attributes {dimension_semantics = [#tpu.dimension_semantics<parallel>], iteration_bounds = array<i64: 2>, scalar_prefetch = 0 : i64, scratch_operands = 0 : i64, tpu.core_type = #tpu.core_type<tc>, window_params = [{transform_indices = @transform_0, window_bounds = array<i64: 1, 38, 4>}, {pipeline_mode = #tpu.pipeline_mode<synchronous>, transform_indices = @transform_1, window_bounds = array<i64: 9, 4, 128>}, {pipeline_mode = #tpu.pipeline_mode<synchronous>, transform_indices = @transform_2, window_bounds = array<i64: 1, 128>}, {transform_indices = @transform_3, window_bounds = array<i64: 1, 1>}, {transform_indices = @transform_4, window_bounds = array<i64: 1, 24, 128>}]} {
    %cst = arith.constant 0.000000e+00 : f32
    %0 = vector.broadcast %cst : f32 to vector<24x128xf32>
    %c0 = arith.constant 0 : index
    %c0_0 = arith.constant 0 : index
    %c0_1 = arith.constant 0 : index
    %1 = vector.load %arg1[%c0, %c0_0, %c0_1] : memref<1x38x4xf32, #tpu.memory_space<vmem>>, vector<1x24x4xf32>
    %2 = vector.shape_cast %1 : vector<1x24x4xf32> to vector<24x4xf32>
    %c0_2 = arith.constant 0 : index
    %c0_3 = arith.constant 0 : index
    %c0_4 = arith.constant 0 : index
    %3 = vector.load %arg2[%c0_2, %c0_3, %c0_4] : memref<9x4x128xf32, #tpu.memory_space<vmem>>, vector<1x4x128xf32>
    %4 = vector.shape_cast %3 : vector<1x4x128xf32> to vector<4x128xf32>
    %cst_5 = arith.constant dense<0.000000e+00> : vector<24x128xf32>
    %5 = tpu.matmul %2, %4, %cst_5 {dimension_numbers = #tpu.dot_dimension_numbers<[1], [0], [0], [1], [0, 0, 1, 1], [], []>} : vector<24x4xf32>, vector<4x128xf32>, vector<24x128xf32> -> vector<24x128xf32>
    %6 = arith.addf %0, %5 : vector<24x128xf32>
    %c0_6 = arith.constant 0 : index
    %c1 = arith.constant 1 : index
    %c0_7 = arith.constant 0 : index
    %7 = vector.load %arg1[%c0_6, %c1, %c0_7] : memref<1x38x4xf32, #tpu.memory_space<vmem>>, vector<1x24x4xf32>
    %8 = vector.shape_cast %7 : vector<1x24x4xf32> to vector<24x4xf32>
    %c1_8 = arith.constant 1 : index
    %c0_9 = arith.constant 0 : index
    %c0_10 = arith.constant 0 : index
    %9 = vector.load %arg2[%c1_8, %c0_9, %c0_10] : memref<9x4x128xf32, #tpu.memory_space<vmem>>, vector<1x4x128xf32>
    %10 = vector.shape_cast %9 : vector<1x4x128xf32> to vector<4x128xf32>
    %cst_11 = arith.constant dense<0.000000e+00> : vector<24x128xf32>
    %11 = tpu.matmul %8, %10, %cst_11 {dimension_numbers = #tpu.dot_dimension_numbers<[1], [0], [0], [1], [0, 0, 1, 1], [], []>} : vector<24x4xf32>, vector<4x128xf32>, vector<24x128xf32> -> vector<24x128xf32>
    %12 = arith.addf %6, %11 : vector<24x128xf32>
    %c0_12 = arith.constant 0 : index
    %c2 = arith.constant 2 : index
    %c0_13 = arith.constant 0 : index
    %13 = vector.load %arg1[%c0_12, %c2, %c0_13] : memref<1x38x4xf32, #tpu.memory_space<vmem>>, vector<1x24x4xf32>
    %14 = vector.shape_cast %13 : vector<1x24x4xf32> to vector<24x4xf32>
    %c2_14 = arith.constant 2 : index
    %c0_15 = arith.constant 0 : index
    %c0_16 = arith.constant 0 : index
    %15 = vector.load %arg2[%c2_14, %c0_15, %c0_16] : memref<9x4x128xf32, #tpu.memory_space<vmem>>, vector<1x4x128xf32>
    %16 = vector.shape_cast %15 : vector<1x4x128xf32> to vector<4x128xf32>
    %cst_17 = arith.constant dense<0.000000e+00> : vector<24x128xf32>
    %17 = tpu.matmul %14, %16, %cst_17 {dimension_numbers = #tpu.dot_dimension_numbers<[1], [0], [0], [1], [0, 0, 1, 1], [], []>} : vector<24x4xf32>, vector<4x128xf32>, vector<24x128xf32> -> vector<24x128xf32>
    %18 = arith.addf %12, %17 : vector<24x128xf32>
    %c0_18 = arith.constant 0 : index
    %c6 = arith.constant 6 : index
    %c0_19 = arith.constant 0 : index
    %19 = vector.load %arg1[%c0_18, %c6, %c0_19] : memref<1x38x4xf32, #tpu.memory_space<vmem>>, vector<1x24x4xf32>
    %20 = vector.shape_cast %19 : vector<1x24x4xf32> to vector<24x4xf32>
    %c3 = arith.constant 3 : index
    %c0_20 = arith.constant 0 : index
    %c0_21 = arith.constant 0 : index
    %21 = vector.load %arg2[%c3, %c0_20, %c0_21] : memref<9x4x128xf32, #tpu.memory_space<vmem>>, vector<1x4x128xf32>
    %22 = vector.shape_cast %21 : vector<1x4x128xf32> to vector<4x128xf32>
    %cst_22 = arith.constant dense<0.000000e+00> : vector<24x128xf32>
    %23 = tpu.matmul %20, %22, %cst_22 {dimension_numbers = #tpu.dot_dimension_numbers<[1], [0], [0], [1], [0, 0, 1, 1], [], []>} : vector<24x4xf32>, vector<4x128xf32>, vector<24x128xf32> -> vector<24x128xf32>
    %24 = arith.addf %18, %23 : vector<24x128xf32>
    %c0_23 = arith.constant 0 : index
    %c7 = arith.constant 7 : index
    %c0_24 = arith.constant 0 : index
    %25 = vector.load %arg1[%c0_23, %c7, %c0_24] : memref<1x38x4xf32, #tpu.memory_space<vmem>>, vector<1x24x4xf32>
    %26 = vector.shape_cast %25 : vector<1x24x4xf32> to vector<24x4xf32>
    %c4 = arith.constant 4 : index
    %c0_25 = arith.constant 0 : index
    %c0_26 = arith.constant 0 : index
    %27 = vector.load %arg2[%c4, %c0_25, %c0_26] : memref<9x4x128xf32, #tpu.memory_space<vmem>>, vector<1x4x128xf32>
    %28 = vector.shape_cast %27 : vector<1x4x128xf32> to vector<4x128xf32>
    %cst_27 = arith.constant dense<0.000000e+00> : vector<24x128xf32>
    %29 = tpu.matmul %26, %28, %cst_27 {dimension_numbers = #tpu.dot_dimension_numbers<[1], [0], [0], [1], [0, 0, 1, 1], [], []>} : vector<24x4xf32>, vector<4x128xf32>, vector<24x128xf32> -> vector<24x128xf32>
    %30 = arith.addf %24, %29 : vector<24x128xf32>
    %c0_28 = arith.constant 0 : index
    %c8 = arith.constant 8 : index
    %c0_29 = arith.constant 0 : index
    %31 = vector.load %arg1[%c0_28, %c8, %c0_29] : memref<1x38x4xf32, #tpu.memory_space<vmem>>, vector<1x24x4xf32>
    %32 = vector.shape_cast %31 : vector<1x24x4xf32> to vector<24x4xf32>
    %c5 = arith.constant 5 : index
    %c0_30 = arith.constant 0 : index
    %c0_31 = arith.constant 0 : index
    %33 = vector.load %arg2[%c5, %c0_30, %c0_31] : memref<9x4x128xf32, #tpu.memory_space<vmem>>, vector<1x4x128xf32>
    %34 = vector.shape_cast %33 : vector<1x4x128xf32> to vector<4x128xf32>
    %cst_32 = arith.constant dense<0.000000e+00> : vector<24x128xf32>
    %35 = tpu.matmul %32, %34, %cst_32 {dimension_numbers = #tpu.dot_dimension_numbers<[1], [0], [0], [1], [0, 0, 1, 1], [], []>} : vector<24x4xf32>, vector<4x128xf32>, vector<24x128xf32> -> vector<24x128xf32>
    %36 = arith.addf %30, %35 : vector<24x128xf32>
    %c0_33 = arith.constant 0 : index
    %c12 = arith.constant 12 : index
    %c0_34 = arith.constant 0 : index
    %37 = vector.load %arg1[%c0_33, %c12, %c0_34] : memref<1x38x4xf32, #tpu.memory_space<vmem>>, vector<1x24x4xf32>
    %38 = vector.shape_cast %37 : vector<1x24x4xf32> to vector<24x4xf32>
    %c6_35 = arith.constant 6 : index
    %c0_36 = arith.constant 0 : index
    %c0_37 = arith.constant 0 : index
    %39 = vector.load %arg2[%c6_35, %c0_36, %c0_37] : memref<9x4x128xf32, #tpu.memory_space<vmem>>, vector<1x4x128xf32>
    %40 = vector.shape_cast %39 : vector<1x4x128xf32> to vector<4x128xf32>
    %cst_38 = arith.constant dense<0.000000e+00> : vector<24x128xf32>
    %41 = tpu.matmul %38, %40, %cst_38 {dimension_numbers = #tpu.dot_dimension_numbers<[1], [0], [0], [1], [0, 0, 1, 1], [], []>} : vector<24x4xf32>, vector<4x128xf32>, vector<24x128xf32> -> vector<24x128xf32>
    %42 = arith.addf %36, %41 : vector<24x128xf32>
    %c0_39 = arith.constant 0 : index
    %c13 = arith.constant 13 : index
    %c0_40 = arith.constant 0 : index
    %43 = vector.load %arg1[%c0_39, %c13, %c0_40] : memref<1x38x4xf32, #tpu.memory_space<vmem>>, vector<1x24x4xf32>
    %44 = vector.shape_cast %43 : vector<1x24x4xf32> to vector<24x4xf32>
    %c7_41 = arith.constant 7 : index
    %c0_42 = arith.constant 0 : index
    %c0_43 = arith.constant 0 : index
    %45 = vector.load %arg2[%c7_41, %c0_42, %c0_43] : memref<9x4x128xf32, #tpu.memory_space<vmem>>, vector<1x4x128xf32>
    %46 = vector.shape_cast %45 : vector<1x4x128xf32> to vector<4x128xf32>
    %cst_44 = arith.constant dense<0.000000e+00> : vector<24x128xf32>
    %47 = tpu.matmul %44, %46, %cst_44 {dimension_numbers = #tpu.dot_dimension_numbers<[1], [0], [0], [1], [0, 0, 1, 1], [], []>} : vector<24x4xf32>, vector<4x128xf32>, vector<24x128xf32> -> vector<24x128xf32>
    %48 = arith.addf %42, %47 : vector<24x128xf32>
    %c0_45 = arith.constant 0 : index
    %c14 = arith.constant 14 : index
    %c0_46 = arith.constant 0 : index
    %49 = vector.load %arg1[%c0_45, %c14, %c0_46] : memref<1x38x4xf32, #tpu.memory_space<vmem>>, vector<1x24x4xf32>
    %50 = vector.shape_cast %49 : vector<1x24x4xf32> to vector<24x4xf32>
    %c8_47 = arith.constant 8 : index
    %c0_48 = arith.constant 0 : index
    %c0_49 = arith.constant 0 : index
    %51 = vector.load %arg2[%c8_47, %c0_48, %c0_49] : memref<9x4x128xf32, #tpu.memory_space<vmem>>, vector<1x4x128xf32>
    %52 = vector.shape_cast %51 : vector<1x4x128xf32> to vector<4x128xf32>
    %cst_50 = arith.constant dense<0.000000e+00> : vector<24x128xf32>
    %53 = tpu.matmul %50, %52, %cst_50 {dimension_numbers = #tpu.dot_dimension_numbers<[1], [0], [0], [1], [0, 0, 1, 1], [], []>} : vector<24x4xf32>, vector<4x128xf32>, vector<24x128xf32> -> vector<24x128xf32>
    %54 = arith.addf %48, %53 : vector<24x128xf32>
    %c0_51 = arith.constant 0 : index
    %c0_52 = arith.constant 0 : index
    %55 = vector.load %arg3[%c0_51, %c0_52] : memref<1x128xf32, #tpu.memory_space<vmem>>, vector<1x128xf32>
    %56 = vector.broadcast %55 : vector<1x128xf32> to vector<24x128xf32>
    %57 = arith.addf %54, %56 : vector<24x128xf32>
    %c0_53 = arith.constant 0 : index
    %c0_54 = arith.constant 0 : index
    %58 = memref.load %arg4[%c0_53, %c0_54] : memref<1x1xf32, #tpu.memory_space<smem>>
    %cst_55 = arith.constant 0.000000e+00 : f32
    %59 = vector.broadcast %cst_55 : f32 to vector<24x128xf32>
    %60 = arith.cmpf ogt, %57, %59 : vector<24x128xf32>
    %61 = vector.broadcast %58 : f32 to vector<24x128xf32>
    %62 = arith.mulf %61, %57 : vector<24x128xf32>
    %63 = arith.select %60, %57, %62 : vector<24x128xi1>, vector<24x128xf32>
    %c0_56 = arith.constant 0 : index
    %c0_57 = arith.constant 0 : index
    %c0_58 = arith.constant 0 : index
    %64 = vector.load %arg5[%c0_56, %c0_57, %c0_58] : memref<1x24x128xf32, #tpu.memory_space<vmem>>, vector<1x24x128xf32>
    %65 = vector.shape_cast %64 : vector<1x24x128xf32> to vector<24x128xf32>
    %66 = vector.shape_cast %63 : vector<24x128xf32> to vector<1x24x128xf32>
    tpu.vector_store %arg5[%c0_56, %c0_57, %c0_58], %66 {strides = array<i32>} : memref<1x24x128xf32, #tpu.memory_space<vmem>>, vector<1x24x128xf32>,
    return
  }
  func.func @transform_0(%arg0: i32) -> (i32, i32, i32) {
    %c0_i32 = arith.constant 0 : i32
    %c0_i32_0 = arith.constant 0 : i32
    %c0_i32_1 = arith.constant 0 : i32
    return %arg0, %c0_i32, %c0_i32_0 : i32, i32, i32
  }
  func.func @transform_1(%arg0: i32) -> (i32, i32, i32) {
    %c0_i32 = arith.constant 0 : i32
    %c0_i32_0 = arith.constant 0 : i32
    %c0_i32_1 = arith.constant 0 : i32
    %c0_i32_2 = arith.constant 0 : i32
    return %c0_i32, %c0_i32_0, %c0_i32_1 : i32, i32, i32
  }
  func.func @transform_2(%arg0: i32) -> (i32, i32) {
    %c0_i32 = arith.constant 0 : i32
    %c0_i32_0 = arith.constant 0 : i32
    %c0_i32_1 = arith.constant 0 : i32
    return %c0_i32, %c0_i32_0 : i32, i32
  }
  func.func @transform_3(%arg0: i32) -> (i32, i32) {
    %c0_i32 = arith.constant 0 : i32
    %c0_i32_0 = arith.constant 0 : i32
    %c0_i32_1 = arith.constant 0 : i32
    return %c0_i32, %c0_i32_0 : i32, i32
  }
  func.func @transform_4(%arg0: i32) -> (i32, i32, i32) {
    %c0_i32 = arith.constant 0 : i32
    %c0_i32_0 = arith.constant 0 : i32
    %c0_i32_1 = arith.constant 0 : i32
    return %arg0, %c0_i32, %c0_i32_0 : i32, i32, i32
  }
}

module attributes {stable_mosaic.version = 11 : i64} {
  func.func @_tap_conv_kernel(%arg0: i32, %arg1: memref<1x26x64xf32, #tpu.memory_space<vmem>>, %arg2: memref<4x64x128xf32, #tpu.memory_space<vmem>>, %arg3: memref<1x128xf32, #tpu.memory_space<vmem>>, %arg4: memref<1x1xf32, #tpu.memory_space<smem>>, %arg5: memref<1x20x128xf32, #tpu.memory_space<vmem>>, %arg6: memref<1x20x128xf32, #tpu.memory_space<vmem>>) attributes {dimension_semantics = [#tpu.dimension_semantics<parallel>], iteration_bounds = array<i64: 2>, scalar_prefetch = 0 : i64, scratch_operands = 0 : i64, tpu.core_type = #tpu.core_type<tc>, window_params = [{transform_indices = @transform_0, window_bounds = array<i64: 1, 26, 64>}, {pipeline_mode = #tpu.pipeline_mode<synchronous>, transform_indices = @transform_1, window_bounds = array<i64: 4, 64, 128>}, {pipeline_mode = #tpu.pipeline_mode<synchronous>, transform_indices = @transform_2, window_bounds = array<i64: 1, 128>}, {transform_indices = @transform_3, window_bounds = array<i64: 1, 1>}, {transform_indices = @transform_4, window_bounds = array<i64: 1, 20, 128>}, {transform_indices = @transform_5, window_bounds = array<i64: 1, 20, 128>}]} {
    %cst = arith.constant 0.000000e+00 : f32
    %0 = vector.broadcast %cst : f32 to vector<20x128xf32>
    %c0 = arith.constant 0 : index
    %c0_0 = arith.constant 0 : index
    %c0_1 = arith.constant 0 : index
    %1 = vector.load %arg1[%c0, %c0_0, %c0_1] : memref<1x26x64xf32, #tpu.memory_space<vmem>>, vector<1x20x64xf32>
    %2 = vector.shape_cast %1 : vector<1x20x64xf32> to vector<20x64xf32>
    %c0_2 = arith.constant 0 : index
    %c0_3 = arith.constant 0 : index
    %c0_4 = arith.constant 0 : index
    %3 = vector.load %arg2[%c0_2, %c0_3, %c0_4] : memref<4x64x128xf32, #tpu.memory_space<vmem>>, vector<1x64x128xf32>
    %4 = vector.shape_cast %3 : vector<1x64x128xf32> to vector<64x128xf32>
    %cst_5 = arith.constant dense<0.000000e+00> : vector<20x128xf32>
    %5 = tpu.matmul %2, %4, %cst_5 {dimension_numbers = #tpu.dot_dimension_numbers<[1], [0], [0], [1], [0, 0, 1, 1], [], []>} : vector<20x64xf32>, vector<64x128xf32>, vector<20x128xf32> -> vector<20x128xf32>
    %6 = arith.addf %0, %5 : vector<20x128xf32>
    %c0_6 = arith.constant 0 : index
    %c1 = arith.constant 1 : index
    %c0_7 = arith.constant 0 : index
    %7 = vector.load %arg1[%c0_6, %c1, %c0_7] : memref<1x26x64xf32, #tpu.memory_space<vmem>>, vector<1x20x64xf32>
    %8 = vector.shape_cast %7 : vector<1x20x64xf32> to vector<20x64xf32>
    %c1_8 = arith.constant 1 : index
    %c0_9 = arith.constant 0 : index
    %c0_10 = arith.constant 0 : index
    %9 = vector.load %arg2[%c1_8, %c0_9, %c0_10] : memref<4x64x128xf32, #tpu.memory_space<vmem>>, vector<1x64x128xf32>
    %10 = vector.shape_cast %9 : vector<1x64x128xf32> to vector<64x128xf32>
    %cst_11 = arith.constant dense<0.000000e+00> : vector<20x128xf32>
    %11 = tpu.matmul %8, %10, %cst_11 {dimension_numbers = #tpu.dot_dimension_numbers<[1], [0], [0], [1], [0, 0, 1, 1], [], []>} : vector<20x64xf32>, vector<64x128xf32>, vector<20x128xf32> -> vector<20x128xf32>
    %12 = arith.addf %6, %11 : vector<20x128xf32>
    %c0_12 = arith.constant 0 : index
    %c5 = arith.constant 5 : index
    %c0_13 = arith.constant 0 : index
    %13 = vector.load %arg1[%c0_12, %c5, %c0_13] : memref<1x26x64xf32, #tpu.memory_space<vmem>>, vector<1x20x64xf32>
    %14 = vector.shape_cast %13 : vector<1x20x64xf32> to vector<20x64xf32>
    %c2 = arith.constant 2 : index
    %c0_14 = arith.constant 0 : index
    %c0_15 = arith.constant 0 : index
    %15 = vector.load %arg2[%c2, %c0_14, %c0_15] : memref<4x64x128xf32, #tpu.memory_space<vmem>>, vector<1x64x128xf32>
    %16 = vector.shape_cast %15 : vector<1x64x128xf32> to vector<64x128xf32>
    %cst_16 = arith.constant dense<0.000000e+00> : vector<20x128xf32>
    %17 = tpu.matmul %14, %16, %cst_16 {dimension_numbers = #tpu.dot_dimension_numbers<[1], [0], [0], [1], [0, 0, 1, 1], [], []>} : vector<20x64xf32>, vector<64x128xf32>, vector<20x128xf32> -> vector<20x128xf32>
    %18 = arith.addf %12, %17 : vector<20x128xf32>
    %c0_17 = arith.constant 0 : index
    %c6 = arith.constant 6 : index
    %c0_18 = arith.constant 0 : index
    %19 = vector.load %arg1[%c0_17, %c6, %c0_18] : memref<1x26x64xf32, #tpu.memory_space<vmem>>, vector<1x20x64xf32>
    %20 = vector.shape_cast %19 : vector<1x20x64xf32> to vector<20x64xf32>
    %c3 = arith.constant 3 : index
    %c0_19 = arith.constant 0 : index
    %c0_20 = arith.constant 0 : index
    %21 = vector.load %arg2[%c3, %c0_19, %c0_20] : memref<4x64x128xf32, #tpu.memory_space<vmem>>, vector<1x64x128xf32>
    %22 = vector.shape_cast %21 : vector<1x64x128xf32> to vector<64x128xf32>
    %cst_21 = arith.constant dense<0.000000e+00> : vector<20x128xf32>
    %23 = tpu.matmul %20, %22, %cst_21 {dimension_numbers = #tpu.dot_dimension_numbers<[1], [0], [0], [1], [0, 0, 1, 1], [], []>} : vector<20x64xf32>, vector<64x128xf32>, vector<20x128xf32> -> vector<20x128xf32>
    %24 = arith.addf %18, %23 : vector<20x128xf32>
    %c0_22 = arith.constant 0 : index
    %c0_23 = arith.constant 0 : index
    %25 = vector.load %arg3[%c0_22, %c0_23] : memref<1x128xf32, #tpu.memory_space<vmem>>, vector<1x128xf32>
    %26 = vector.broadcast %25 : vector<1x128xf32> to vector<20x128xf32>
    %27 = arith.addf %24, %26 : vector<20x128xf32>
    %c0_24 = arith.constant 0 : index
    %c0_25 = arith.constant 0 : index
    %28 = memref.load %arg4[%c0_24, %c0_25] : memref<1x1xf32, #tpu.memory_space<smem>>
    %cst_26 = arith.constant 0.000000e+00 : f32
    %29 = vector.broadcast %cst_26 : f32 to vector<20x128xf32>
    %30 = arith.cmpf ogt, %27, %29 : vector<20x128xf32>
    %31 = vector.broadcast %28 : f32 to vector<20x128xf32>
    %32 = arith.mulf %31, %27 : vector<20x128xf32>
    %33 = arith.select %30, %27, %32 : vector<20x128xi1>, vector<20x128xf32>
    %c0_27 = arith.constant 0 : index
    %c0_28 = arith.constant 0 : index
    %c0_29 = arith.constant 0 : index
    %34 = vector.load %arg5[%c0_27, %c0_28, %c0_29] : memref<1x20x128xf32, #tpu.memory_space<vmem>>, vector<1x20x128xf32>
    %35 = vector.shape_cast %34 : vector<1x20x128xf32> to vector<20x128xf32>
    %36 = arith.addf %33, %35 : vector<20x128xf32>
    %c0_30 = arith.constant 0 : index
    %c0_31 = arith.constant 0 : index
    %c0_32 = arith.constant 0 : index
    %37 = vector.load %arg6[%c0_30, %c0_31, %c0_32] : memref<1x20x128xf32, #tpu.memory_space<vmem>>, vector<1x20x128xf32>
    %38 = vector.shape_cast %37 : vector<1x20x128xf32> to vector<20x128xf32>
    %39 = vector.shape_cast %36 : vector<20x128xf32> to vector<1x20x128xf32>
    tpu.vector_store %arg6[%c0_30, %c0_31, %c0_32], %39 {strides = array<i32>} : memref<1x20x128xf32, #tpu.memory_space<vmem>>, vector<1x20x128xf32>,
    return
  }
  func.func @transform_0(%arg0: i32) -> (i32, i32, i32) {
    %c0_i32 = arith.constant 0 : i32
    %c0_i32_0 = arith.constant 0 : i32
    %c0_i32_1 = arith.constant 0 : i32
    return %arg0, %c0_i32, %c0_i32_0 : i32, i32, i32
  }
  func.func @transform_1(%arg0: i32) -> (i32, i32, i32) {
    %c0_i32 = arith.constant 0 : i32
    %c0_i32_0 = arith.constant 0 : i32
    %c0_i32_1 = arith.constant 0 : i32
    %c0_i32_2 = arith.constant 0 : i32
    return %c0_i32, %c0_i32_0, %c0_i32_1 : i32, i32, i32
  }
  func.func @transform_2(%arg0: i32) -> (i32, i32) {
    %c0_i32 = arith.constant 0 : i32
    %c0_i32_0 = arith.constant 0 : i32
    %c0_i32_1 = arith.constant 0 : i32
    return %c0_i32, %c0_i32_0 : i32, i32
  }
  func.func @transform_3(%arg0: i32) -> (i32, i32) {
    %c0_i32 = arith.constant 0 : i32
    %c0_i32_0 = arith.constant 0 : i32
    %c0_i32_1 = arith.constant 0 : i32
    return %c0_i32, %c0_i32_0 : i32, i32
  }
  func.func @transform_4(%arg0: i32) -> (i32, i32, i32) {
    %c0_i32 = arith.constant 0 : i32
    %c0_i32_0 = arith.constant 0 : i32
    %c0_i32_1 = arith.constant 0 : i32
    return %arg0, %c0_i32, %c0_i32_0 : i32, i32, i32
  }
  func.func @transform_5(%arg0: i32) -> (i32, i32, i32) {
    %c0_i32 = arith.constant 0 : i32
    %c0_i32_0 = arith.constant 0 : i32
    %c0_i32_1 = arith.constant 0 : i32
    return %arg0, %c0_i32, %c0_i32_0 : i32, i32, i32
  }
}

</mosaic_0001>

<bundles_post_ra>
// kernel: d_down_block.4
= control target key start
LH: loop header
LB: loop body
LE: loop exit
PB: predicated region body
PF: predicated region fallthrough
CT: control target
= control target key end

     0   :  { %s926_s17 = smov 0   ;;  %s1124_s0 = inlined_call_operand.vmem [shape: f32[2,256,4], index: 0, kind: input, shape index: {}]   ;;  %s1125_s1 = inlined_call_operand.vmem [shape: f32[1,4,128], index: 1, kind: input, shape index: {}]   ;;  %s1126_s2 = inlined_call_operand.vmem [shape: f32[1,128], index: 2, kind: input, shape index: {}]   ;;  %s1127_s3 = inlined_call_operand.<no memory space> [shape: f32[1,1], index: 3, kind: input, shape index: {}]   ;;  %s1128_s4 = inlined_call_operand.vmem [shape: f32[2,256,128], index: 4, kind: output, shape index: {}]  }
   0x1   :  { %9 = sst [smem:[#allocation2]] %s1127_s3 }
   0x2 LB: > { %s750_s18 = sadd.s32 4294967295, %s896_s17   ;;  %p754_p0 = scmp.ge.s32.totalorder %s896_s17, 1  ;;  %s896_s17 = sphi %s926_s17, %s15_s17  }
   0x3   : > { %p163_p1 = scmp.lt.s32.totalorder %s896_s17, 3 }
   0x5   : > { %p164_p2 = pnand %p754_p0, %p163_p1 }
   0x6   : > { %v231_v0 = vld [vmem:[%s1125_s1] sm:$0xf] (!%p164_p2)  ;;  %vm336_vm0 = vcmask (!%p164_p2), 1043456   ;;  %p189_p3 = scmp.lt.s32.totalorder (!%p164_p2), %s750_s18, 1  ;;  %vm239_vm1 = vcmask (!%p164_p2), 31744   ;;  %s565_s24 = sld [smem:[#allocation2]] (!%p164_p2) }
   0x7   : > { %167 = sbr.rel (%p164_p2) target bundleno = 267 (0x10b), region = 36  ;;  %830 = vmatprep.subr.msk.mxu0 (!%p164_p2), %vm336_vm0, %v231_v0  ;;  %880 = vmatprep.subr.msk.mxu1 (!%p164_p2), %vm336_vm0, %v231_v0  ;;  %v1014_v33 = vld [vmem:[%s1126_s2] ss:$0 sm:$0xff] (!%p164_p2) }
   0x8   : > { %831 = vmatpush3.msk.msra.mxu0 (!%p164_p2), %vm336_vm0, %v231_v0  ;;  %881 = vmatpush3.msk.msra.mxu1 (!%p164_p2), %vm336_vm0, %v231_v0 }
   0xc   : > { %v1016_v35 = vstv (!%p164_p2), %s565_s24 }
   0xe   : > { %s1130_s18 = smov (!%p189_p3, %s750_s18), 1 }
   0xf   : > { %s795_s3 = sshll.u32 %s1130_s18, 8 }
  0x10   : > { %s945_s23 = scalar_lea.vmem %s1124_s0, %s795_s3  ;;  %s1027_s29 = scalar_lea.vmem %s1128_s4, %s795_s3 }
  0x11   : > { %v199_v1 = vld [vmem:[%s945_s23] sm:$0xff]  ;;  %v200_v3 = vld [vmem:[%s945_s23 + $0x8] sm:$0xff]  ;;  %v201_v5 = vld [vmem:[%s945_s23 + $0x10] sm:$0xff] }
  0x12   : > { %v215_v2 = vld [vmem:[%s945_s23 + $0x80] sm:$0xff]  ;;  %832 = vmatprep.mubr.msk.f32.mxu0 %vm239_vm1, %v199_v1  ;;  %v216_v4 = vld [vmem:[%s945_s23 + $0x88] sm:$0xff]  ;;  %v217_v6 = vld [vmem:[%s945_s23 + $0x90] sm:$0xff] }
  0x13   : > { %856 = vmatprep.mubr.msk.f32.mxu1 %vm239_vm1, %v215_v2  ;;  %833 = vmatmul.mubr.msk.f32.vlgmr.msra.gmra.mrb[0].mxu0 %vm239_vm1, %v200_v3  ;;  %v202_v7 = vld [vmem:[%s945_s23 + $0x18] sm:$0xff]  ;;  %v203_v9 = vld [vmem:[%s945_s23 + $0x20] sm:$0xff]  ;;  %v204_v11 = vld [vmem:[%s945_s23 + $0x28] sm:$0xff] }
  0x14   : > { %857 = vmatmul.mubr.msk.f32.vlgmr.msra.gmra.mrb[0].mxu1 %vm239_vm1, %v216_v4  ;;  %835 = vmatprep.mubr.msk.f32.mxu0 %vm239_vm1, %v201_v5  ;;  %v218_v8 = vld [vmem:[%s945_s23 + $0x98] sm:$0xff]  ;;  %v219_v10 = vld [vmem:[%s945_s23 + $0xa0] sm:$0xff]  ;;  %v220_v12 = vld [vmem:[%s945_s23 + $0xa8] sm:$0xff] }
  0x15   : > { %859 = vmatprep.mubr.msk.f32.mxu1 %vm239_vm1, %v217_v6  ;;  %v205_v13 = vld [vmem:[%s945_s23 + $0x30] sm:$0xff]  ;;  %v206_v15 = vld [vmem:[%s945_s23 + $0x38] sm:$0xff]  ;;  %v207_v17 = vld [vmem:[%s945_s23 + $0x40] sm:$0xff] }
  0x16   : > { %v221_v14 = vld [vmem:[%s945_s23 + $0xb0] sm:$0xff]  ;;  %v222_v16 = vld [vmem:[%s945_s23 + $0xb8] sm:$0xff]  ;;  %v223_v18 = vld [vmem:[%s945_s23 + $0xc0] sm:$0xff] }
  0x17   : > { %836 = vmatmul.mubr.msk.f32.gmra.mrb[2].mxu0 %vm239_vm1, %v202_v7  ;;  %v208_v19 = vld [vmem:[%s945_s23 + $0x48] sm:$0xff]  ;;  %v209_v21 = vld [vmem:[%s945_s23 + $0x50] sm:$0xff]  ;;  %v210_v23 = vld [vmem:[%s945_s23 + $0x58] sm:$0xff] }
  0x18   : > { %860 = vmatmul.mubr.msk.f32.gmra.mrb[2].mxu1 %vm239_vm1, %v218_v8  ;;  %838 = vmatprep.mubr.msk.f32.mxu0 %vm239_vm1, %v203_v9  ;;  %v224_v20 = vld [vmem:[%s945_s23 + $0xc8] sm:$0xff]  ;;  %v225_v22 = vld [vmem:[%s945_s23 + $0xd0] sm:$0xff]  ;;  %v226_v24 = vld [vmem:[%s945_s23 + $0xd8] sm:$0xff] }
  0x19   : > { %862 = vmatprep.mubr.msk.f32.mxu1 %vm239_vm1, %v219_v10  ;;  %v211_v25 = vld [vmem:[%s945_s23 + $0x60] sm:$0xff]  ;;  %v212_v27 = vld [vmem:[%s945_s23 + $0x68] sm:$0xff]  ;;  %v213_v29 = vld [vmem:[%s945_s23 + $0x70] sm:$0xff] }
  0x1a   : > { %v227_v26 = vld [vmem:[%s945_s23 + $0xe0] sm:$0xff]  ;;  %v228_v28 = vld [vmem:[%s945_s23 + $0xe8] sm:$0xff]  ;;  %v229_v30 = vld [vmem:[%s945_s23 + $0xf0] sm:$0xff] }
  0x1b   : > { %839 = vmatmul.mubr.msk.f32.gmra.mrb[4].mxu0 %vm239_vm1, %v204_v11  ;;  %v214_v31 = vld [vmem:[%s945_s23 + $0x78] sm:$0xff] }
  0x1c   : > { %863 = vmatmul.mubr.msk.f32.gmra.mrb[4].mxu1 %vm239_vm1, %v220_v12  ;;  %841 = vmatprep.mubr.msk.f32.mxu0 %vm239_vm1, %v205_v13  ;;  %v230_v32 = vld [vmem:[%s945_s23 + $0xf8] sm:$0xff] }
  0x1d   : > { %865 = vmatprep.mubr.msk.f32.mxu1 %vm239_vm1, %v221_v14 }
  0x1f   : > { %842 = vmatmul.mubr.msk.f32.gmra.mrb[6].mxu0 %vm239_vm1, %v206_v15 }
  0x20   : > { %866 = vmatmul.mubr.msk.f32.gmra.mrb[6].mxu1 %vm239_vm1, %v222_v16  ;;  %844 = vmatprep.mubr.msk.f32.mxu0 %vm239_vm1, %v207_v17 }
  0x21   : > { %868 = vmatprep.mubr.msk.f32.mxu1 %vm239_vm1, %v223_v18 }
  0x23   : > { %845 = vmatmul.mubr.msk.f32.gmra.mrb[8].mxu0 %vm239_vm1, %v208_v19 }
  0x24   : > { %869 = vmatmul.mubr.msk.f32.gmra.mrb[8].mxu1 %vm239_vm1, %v224_v20  ;;  %847 = vmatprep.mubr.msk.f32.mxu0 %vm239_vm1, %v209_v21 }
  0x25   : > { %871 = vmatprep.mubr.msk.f32.mxu1 %vm239_vm1, %v225_v22 }
  0x27   : > { %848 = vmatmul.mubr.msk.f32.gmra.mrb[10].mxu0 %vm239_vm1, %v210_v23 }
  0x28   : > { %872 = vmatmul.mubr.msk.f32.gmra.mrb[10].mxu1 %vm239_vm1, %v226_v24  ;;  %850 = vmatprep.mubr.msk.f32.mxu0 %vm239_vm1, %v211_v25 }
  0x29   : > { %874 = vmatprep.mubr.msk.f32.mxu1 %vm239_vm1, %v227_v26 }
  0x2b   : > { %851 = vmatmul.mubr.msk.f32.gmra.mrb[12].mxu0 %vm239_vm1, %v212_v27 }
  0x2c   : > { %875 = vmatmul.mubr.msk.f32.gmra.mrb[12].mxu1 %vm239_vm1, %v228_v28  ;;  %853 = vmatprep.mubr.msk.f32.mxu0 %vm239_vm1, %v213_v29 }
  0x2d   : > { %877 = vmatprep.mubr.msk.f32.mxu1 %vm239_vm1, %v229_v30 }
  0x2f   : > { %854 = vmatmul.mubr.msk.f32.gmra.mrb[14].mxu0 %vm239_vm1, %v214_v31 }
  0x30   : > { %878 = vmatmul.mubr.msk.f32.gmra.mrb[14].mxu1 %vm239_vm1, %v230_v32 }
  0xe6   : > { %v834_v34 = vpop.f32.mrb[0].mxu0 }
  0xe7   : > { %v858_v36 = vpop.f32.mrb[0].mxu1  ;;  %v412_v37 = vadd.f32 %v834_v34, %v1014_v33  ;;  %v406_v39 = vpop.f32.mrb[1].mxu0 }
  0xe8   : > { %v492_v38 = vadd.f32 %v858_v36, %v1014_v33  ;;  %v486_v40 = vpop.f32.mrb[1].mxu1  ;;  %v407_v41 = vadd.f32 %v1014_v33, %v406_v39 }
  0xe9   : > { %v487_v42 = vadd.f32 %v1014_v33, %v486_v40  ;;  %vm567_vm2 = vcmp.gt.f32.partialorder %v412_v37, 0.0  ;;  %v600_v43 = vmul.f32 %v1016_v35, %v412_v37 }
  0xea   : > { %vm583_vm3 = vcmp.gt.f32.partialorder %v492_v38, 0.0  ;;  %v616_v44 = vmul.f32 %v1016_v35, %v492_v38  ;;  %vm566_vm4 = vcmp.gt.f32.partialorder %v407_v41, 0.0  ;;  %v599_v45 = vmul.f32 %v1016_v35, %v407_v41  ;;  %v837_v47 = vpop.f32.mrb[2].mxu0 }
  0xeb   : > { %vm582_vm5 = vcmp.gt.f32.partialorder %v487_v42, 0.0  ;;  %v615_v46 = vmul.f32 %v1016_v35, %v487_v42  ;;  %v861_v48 = vpop.f32.mrb[2].mxu1  ;;  %v632_v49 = vsel %vm567_vm2, %v412_v37, %v600_v43  ;;  %v422_v51 = vadd.f32 %v837_v47, %v1014_v33  ;;  %v416_v53 = vpop.f32.mrb[3].mxu0 }
  0xec   : > { %v648_v50 = vsel %vm583_vm3, %v492_v38, %v616_v44  ;;  %v502_v52 = vadd.f32 %v861_v48, %v1014_v33  ;;  %v496_v54 = vpop.f32.mrb[3].mxu1  ;;  %664 = vst [vmem:[%s1027_s29 + $0x8] sm:$0xff] %v632_v49  ;;  %v631_v55 = vsel %vm566_vm4, %v407_v41, %v599_v45  ;;  %v417_v57 = vadd.f32 %v1014_v33, %v416_v53 }
  0xed   : > { %680 = vst [vmem:[%s1027_s29 + $0x88] sm:$0xff] %v648_v50  ;;  %v647_v56 = vsel %vm582_vm5, %v487_v42, %v615_v46  ;;  %v497_v58 = vadd.f32 %v1014_v33, %v496_v54  ;;  %663 = vst [vmem:[%s1027_s29] sm:$0xff] %v631_v55  ;;  %vm569_vm6 = vcmp.gt.f32.partialorder %v422_v51, 0.0  ;;  %v602_v59 = vmul.f32 %v1016_v35, %v422_v51 }
  0xee   : > { %679 = vst [vmem:[%s1027_s29 + $0x80] sm:$0xff] %v647_v56  ;;  %vm585_vm7 = vcmp.gt.f32.partialorder %v502_v52, 0.0  ;;  %v618_v60 = vmul.f32 %v1016_v35, %v502_v52  ;;  %vm568_vm8 = vcmp.gt.f32.partialorder %v417_v57, 0.0  ;;  %v601_v61 = vmul.f32 %v1016_v35, %v417_v57  ;;  %v840_v63 = vpop.f32.mrb[4].mxu0 }
  0xef   : > { %vm584_vm9 = vcmp.gt.f32.partialorder %v497_v58, 0.0  ;;  %v617_v62 = vmul.f32 %v1016_v35, %v497_v58  ;;  %v864_v0 = vpop.f32.mrb[4].mxu1  ;;  %v634_v1 = vsel %vm569_vm6, %v422_v51, %v602_v59  ;;  %v432_v3 = vadd.f32 %v840_v63, %v1014_v33  ;;  %v426_v5 = vpop.f32.mrb[5].mxu0 }
  0xf0   : > { %v650_v2 = vsel %vm585_vm7, %v502_v52, %v618_v60  ;;  %v512_v4 = vadd.f32 %v864_v0, %v1014_v33  ;;  %v506_v6 = vpop.f32.mrb[5].mxu1  ;;  %666 = vst [vmem:[%s1027_s29 + $0x18] sm:$0xff] %v634_v1  ;;  %v633_v7 = vsel %vm568_vm8, %v417_v57, %v601_v61  ;;  %v427_v9 = vadd.f32 %v1014_v33, %v426_v5 }
  0xf1   : > { %682 = vst [vmem:[%s1027_s29 + $0x98] sm:$0xff] %v650_v2  ;;  %v649_v8 = vsel %vm584_vm9, %v497_v58, %v617_v62  ;;  %v507_v10 = vadd.f32 %v1014_v33, %v506_v6  ;;  %665 = vst [vmem:[%s1027_s29 + $0x10] sm:$0xff] %v633_v7  ;;  %vm571_vm10 = vcmp.gt.f32.partialorder %v432_v3, 0.0  ;;  %v604_v11 = vmul.f32 %v1016_v35, %v432_v3 }
  0xf2   : > { %681 = vst [vmem:[%s1027_s29 + $0x90] sm:$0xff] %v649_v8  ;;  %vm587_vm11 = vcmp.gt.f32.partialorder %v512_v4, 0.0  ;;  %v620_v12 = vmul.f32 %v1016_v35, %v512_v4  ;;  %vm570_vm12 = vcmp.gt.f32.partialorder %v427_v9, 0.0  ;;  %v603_v13 = vmul.f32 %v1016_v35, %v427_v9  ;;  %v843_v15 = vpop.f32.mrb[6].mxu0 }
  0xf3   : > { %vm586_vm13 = vcmp.gt.f32.partialorder %v507_v10, 0.0  ;;  %v619_v14 = vmul.f32 %v1016_v35, %v507_v10  ;;  %v867_v16 = vpop.f32.mrb[6].mxu1  ;;  %v636_v17 = vsel %vm571_vm10, %v432_v3, %v604_v11  ;;  %v442_v19 = vadd.f32 %v843_v15, %v1014_v33  ;;  %v436_v21 = vpop.f32.mrb[7].mxu0 }
  0xf4   : > { %v652_v18 = vsel %vm587_vm11, %v512_v4, %v620_v12  ;;  %v522_v20 = vadd.f32 %v867_v16, %v1014_v33  ;;  %v516_v22 = vpop.f32.mrb[7].mxu1  ;;  %668 = vst [vmem:[%s1027_s29 + $0x28] sm:$0xff] %v636_v17  ;;  %v635_v23 = vsel %vm570_vm12, %v427_v9, %v603_v13  ;;  %v437_v25 = vadd.f32 %v1014_v33, %v436_v21 }
  0xf5   : > { %684 = vst [vmem:[%s1027_s29 + $0xa8] sm:$0xff] %v652_v18  ;;  %v651_v24 = vsel %vm586_vm13, %v507_v10, %v619_v14  ;;  %v517_v26 = vadd.f32 %v1014_v33, %v516_v22  ;;  %667 = vst [vmem:[%s1027_s29 + $0x20] sm:$0xff] %v635_v23  ;;  %vm573_vm14 = vcmp.gt.f32.partialorder %v442_v19, 0.0  ;;  %v606_v27 = vmul.f32 %v1016_v35, %v442_v19 }
  0xf6   : > { %683 = vst [vmem:[%s1027_s29 + $0xa0] sm:$0xff] %v651_v24  ;;  %vm589_vm15 = vcmp.gt.f32.partialorder %v522_v20, 0.0  ;;  %v622_v28 = vmul.f32 %v1016_v35, %v522_v20  ;;  %vm572_vm0 = vcmp.gt.f32.partialorder %v437_v25, 0.0  ;;  %v605_v29 = vmul.f32 %v1016_v35, %v437_v25  ;;  %v846_v31 = vpop.f32.mrb[8].mxu0 }
  0xf7   : > { %vm588_vm1 = vcmp.gt.f32.partialorder %v517_v26, 0.0  ;;  %v621_v30 = vmul.f32 %v1016_v35, %v517_v26  ;;  %v870_v32 = vpop.f32.mrb[8].mxu1  ;;  %v638_v34 = vsel %vm573_vm14, %v442_v19, %v606_v27  ;;  %v452_v37 = vadd.f32 %v846_v31, %v1014_v33  ;;  %v446_v39 = vpop.f32.mrb[9].mxu0 }
  0xf8   : > { %v654_v36 = vsel %vm589_vm15, %v522_v20, %v622_v28  ;;  %v532_v38 = vadd.f32 %v870_v32, %v1014_v33  ;;  %v526_v40 = vpop.f32.mrb[9].mxu1  ;;  %670 = vst [vmem:[%s1027_s29 + $0x38] sm:$0xff] %v638_v34  ;;  %v637_v41 = vsel %vm572_vm0, %v437_v25, %v605_v29  ;;  %v447_v43 = vadd.f32 %v1014_v33, %v446_v39 }
  0xf9   : > { %686 = vst [vmem:[%s1027_s29 + $0xb8] sm:$0xff] %v654_v36  ;;  %v653_v42 = vsel %vm588_vm1, %v517_v26, %v621_v30  ;;  %v527_v44 = vadd.f32 %v1014_v33, %v526_v40  ;;  %669 = vst [vmem:[%s1027_s29 + $0x30] sm:$0xff] %v637_v41  ;;  %vm575_vm2 = vcmp.gt.f32.partialorder %v452_v37, 0.0  ;;  %v608_v45 = vmul.f32 %v1016_v35, %v452_v37 }
  0xfa   : > { %685 = vst [vmem:[%s1027_s29 + $0xb0] sm:$0xff] %v653_v42  ;;  %vm591_vm3 = vcmp.gt.f32.partialorder %v532_v38, 0.0  ;;  %v624_v46 = vmul.f32 %v1016_v35, %v532_v38  ;;  %vm574_vm4 = vcmp.gt.f32.partialorder %v447_v43, 0.0  ;;  %v607_v47 = vmul.f32 %v1016_v35, %v447_v43  ;;  %v849_v49 = vpop.f32.mrb[10].mxu0 }
  0xfb   : > { %vm590_vm5 = vcmp.gt.f32.partialorder %v527_v44, 0.0  ;;  %v623_v48 = vmul.f32 %v1016_v35, %v527_v44  ;;  %v873_v50 = vpop.f32.mrb[10].mxu1  ;;  %v640_v51 = vsel %vm575_vm2, %v452_v37, %v608_v45  ;;  %v462_v53 = vadd.f32 %v849_v49, %v1014_v33  ;;  %v456_v55 = vpop.f32.mrb[11].mxu0 }
  0xfc   : > { %v656_v52 = vsel %vm591_vm3, %v532_v38, %v624_v46  ;;  %v542_v54 = vadd.f32 %v873_v50, %v1014_v33  ;;  %v536_v56 = vpop.f32.mrb[11].mxu1  ;;  %672 = vst [vmem:[%s1027_s29 + $0x48] sm:$0xff] %v640_v51  ;;  %v639_v57 = vsel %vm574_vm4, %v447_v43, %v607_v47  ;;  %v457_v59 = vadd.f32 %v1014_v33, %v456_v55 }
  0xfd   : > { %688 = vst [vmem:[%s1027_s29 + $0xc8] sm:$0xff] %v656_v52  ;;  %v655_v58 = vsel %vm590_vm5, %v527_v44, %v623_v48  ;;  %v537_v60 = vadd.f32 %v1014_v33, %v536_v56  ;;  %671 = vst [vmem:[%s1027_s29 + $0x40] sm:$0xff] %v639_v57  ;;  %vm577_vm6 = vcmp.gt.f32.partialorder %v462_v53, 0.0  ;;  %v610_v61 = vmul.f32 %v1016_v35, %v462_v53 }
  0xfe   : > { %687 = vst [vmem:[%s1027_s29 + $0xc0] sm:$0xff] %v655_v58  ;;  %vm593_vm7 = vcmp.gt.f32.partialorder %v542_v54, 0.0  ;;  %v626_v62 = vmul.f32 %v1016_v35, %v542_v54  ;;  %vm576_vm8 = vcmp.gt.f32.partialorder %v457_v59, 0.0  ;;  %v609_v63 = vmul.f32 %v1016_v35, %v457_v59  ;;  %v852_v1 = vpop.f32.mrb[12].mxu0 }
  0xff   : > { %vm592_vm9 = vcmp.gt.f32.partialorder %v537_v60, 0.0  ;;  %v625_v0 = vmul.f32 %v1016_v35, %v537_v60  ;;  %v876_v2 = vpop.f32.mrb[12].mxu1  ;;  %v642_v3 = vsel %vm577_vm6, %v462_v53, %v610_v61  ;;  %v472_v5 = vadd.f32 %v852_v1, %v1014_v33  ;;  %v466_v7 = vpop.f32.mrb[13].mxu0 }
 0x100   : > { %v658_v4 = vsel %vm593_vm7, %v542_v54, %v626_v62  ;;  %v552_v6 = vadd.f32 %v876_v2, %v1014_v33  ;;  %v546_v8 = vpop.f32.mrb[13].mxu1  ;;  %674 = vst [vmem:[%s1027_s29 + $0x58] sm:$0xff] %v642_v3  ;;  %v641_v9 = vsel %vm576_vm8, %v457_v59, %v609_v63  ;;  %v467_v11 = vadd.f32 %v1014_v33, %v466_v7 }
 0x101   : > { %690 = vst [vmem:[%s1027_s29 + $0xd8] sm:$0xff] %v658_v4  ;;  %v657_v10 = vsel %vm592_vm9, %v537_v60, %v625_v0  ;;  %v547_v12 = vadd.f32 %v1014_v33, %v546_v8  ;;  %673 = vst [vmem:[%s1027_s29 + $0x50] sm:$0xff] %v641_v9  ;;  %vm579_vm10 = vcmp.gt.f32.partialorder %v472_v5, 0.0  ;;  %v612_v13 = vmul.f32 %v1016_v35, %v472_v5 }
 0x102   : > { %689 = vst [vmem:[%s1027_s29 + $0xd0] sm:$0xff] %v657_v10  ;;  %vm595_vm11 = vcmp.gt.f32.partialorder %v552_v6, 0.0  ;;  %v628_v14 = vmul.f32 %v1016_v35, %v552_v6  ;;  %vm578_vm12 = vcmp.gt.f32.partialorder %v467_v11, 0.0  ;;  %v611_v15 = vmul.f32 %v1016_v35, %v467_v11  ;;  %v855_v17 = vpop.f32.mrb[14].mxu0 }
 0x103   : > { %vm594_vm13 = vcmp.gt.f32.partialorder %v547_v12, 0.0  ;;  %v627_v16 = vmul.f32 %v1016_v35, %v547_v12  ;;  %v879_v18 = vpop.f32.mrb[14].mxu1  ;;  %v644_v19 = vsel %vm579_vm10, %v472_v5, %v612_v13  ;;  %v482_v21 = vadd.f32 %v855_v17, %v1014_v33  ;;  %v476_v23 = vpop.f32.mrb[15].mxu0 }
 0x104   : > { %v660_v20 = vsel %vm595_vm11, %v552_v6, %v628_v14  ;;  %v562_v22 = vadd.f32 %v879_v18, %v1014_v33  ;;  %v556_v24 = vpop.f32.mrb[15].mxu1  ;;  %676 = vst [vmem:[%s1027_s29 + $0x68] sm:$0xff] %v644_v19  ;;  %v643_v25 = vsel %vm578_vm12, %v467_v11, %v611_v15  ;;  %v477_v27 = vadd.f32 %v1014_v33, %v476_v23 }
 0x105   : > { %692 = vst [vmem:[%s1027_s29 + $0xe8] sm:$0xff] %v660_v20  ;;  %v659_v26 = vsel %vm594_vm13, %v547_v12, %v627_v16  ;;  %v557_v28 = vadd.f32 %v1014_v33, %v556_v24  ;;  %675 = vst [vmem:[%s1027_s29 + $0x60] sm:$0xff] %v643_v25  ;;  %vm581_vm14 = vcmp.gt.f32.partialorder %v482_v21, 0.0  ;;  %v614_v29 = vmul.f32 %v1016_v35, %v482_v21 }
 0x106   : > { %691 = vst [vmem:[%s1027_s29 + $0xe0] sm:$0xff] %v659_v26  ;;  %vm597_vm15 = vcmp.gt.f32.partialorder %v562_v22, 0.0  ;;  %v630_v30 = vmul.f32 %v1016_v35, %v562_v22  ;;  %vm580_vm0 = vcmp.gt.f32.partialorder %v477_v27, 0.0  ;;  %v613_v31 = vmul.f32 %v1016_v35, %v477_v27 }
 0x107   : > { %vm596_vm1 = vcmp.gt.f32.partialorder %v557_v28, 0.0  ;;  %v629_v32 = vmul.f32 %v1016_v35, %v557_v28  ;;  %v646_v34 = vsel %vm581_vm14, %v482_v21, %v614_v29 }
 0x108   : > { %v662_v36 = vsel %vm597_vm15, %v562_v22, %v630_v30  ;;  %678 = vst [vmem:[%s1027_s29 + $0x78] sm:$0xff] %v646_v34  ;;  %v645_v33 = vsel %vm580_vm0, %v477_v27, %v613_v31 }
 0x109   : > { %694 = vst [vmem:[%s1027_s29 + $0xf8] sm:$0xff] %v662_v36  ;;  %v661_v37 = vsel %vm596_vm1, %v557_v28, %v629_v32  ;;  %677 = vst [vmem:[%s1027_s29 + $0x70] sm:$0xff] %v645_v33 }
 0x10a   : > { %693 = vst [vmem:[%s1027_s29 + $0xf0] sm:$0xff] %v661_v37 }
 0x10b PF: > { %s15_s17 = sadd.s32 1, %s896_s17  }
 0x10c   : > { %p12_p4 = scmp.ge.s32.totalorder %s15_s17, 4  }
 0x10e   :  { %14 = sbr.rel (!%p12_p4) target bundleno = 2 (0x2), region = 66 }

// kernel: d_down_block.5
= control target key start
LH: loop header
LB: loop body
LE: loop exit
PB: predicated region body
PF: predicated region fallthrough
CT: control target
= control target key end

     0   :  { %s979_s17 = smov 0   ;;  %s1175_s0 = inlined_call_operand.vmem [shape: f32[2,26,64], index: 0, kind: input, shape index: {}]   ;;  %s1176_s1 = inlined_call_operand.vmem [shape: f32[4,64,128], index: 1, kind: input, shape index: {}]   ;;  %s1177_s2 = inlined_call_operand.vmem [shape: f32[1,128], index: 2, kind: input, shape index: {}]   ;;  %s1178_s3 = inlined_call_operand.<no memory space> [shape: f32[1,1], index: 3, kind: input, shape index: {}]   ;;  %s1179_s4 = inlined_call_operand.vmem [shape: f32[2,20,128], index: 4, kind: output, shape index: {}]  }
   0x1   :  { %9 = sst [smem:[#allocation2]] %s1178_s3 }
   0x2 LB: > { %s688_s18 = sadd.s32 4294967295, %s946_s17   ;;  %p692_p0 = scmp.ge.s32.totalorder %s946_s17, 1  ;;  %s946_s17 = sphi %s979_s17, %s15_s17  }
   0x3   : > { %p163_p1 = scmp.lt.s32.totalorder %s946_s17, 3 }
   0x5   : > { %p164_p2 = pnand %p692_p0, %p163_p1 }
   0x6   : > { %v696_v0 = vld [vmem:[%s1176_s1 + $0x40] sm:$0xff] (!%p164_p2)  ;;  %v697_v1 = vld [vmem:[%s1176_s1 + $0x48] sm:$0xff] (!%p164_p2)  ;;  %v948_v3 = vmov (!%p164_p2), 0.0|0.0   ;;  %v698_v6 = vld [vmem:[%s1176_s1 + $0x50] sm:$0xff] (!%p164_p2)  ;;  %p1009_p3 = scmp.lt.s32.totalorder (!%p164_p2), %s688_s18, 1  ;;  %vm949_vm0 = vmmov (!%p164_p2), 0  }
   0x7   : > { %167 = sbr.rel (%p164_p2) target bundleno = 270 (0x10e), region = 36  ;;  %v202_v2 = vld [vmem:[%s1176_s1] sm:$0xff] (!%p164_p2)  ;;  %880 = vmatprep.subr.bf16.mxu0 (!%p164_p2), %v948_v3  ;;  %v881_v4 = vpack.c.bf16 (!%p164_p2), %v697_v1, %v696_v0  ;;  %892 = vmatprep.subr.bf16.mxu1 (!%p164_p2), %v948_v3  ;;  %v203_v5 = vld [vmem:[%s1176_s1 + $0x8] sm:$0xff] (!%p164_p2)  ;;  %v699_v7 = vld [vmem:[%s1176_s1 + $0x58] sm:$0xff] (!%p164_p2)  ;;  %v950_v11 = vmov (!%p164_p2), 0.0   ;;  %vm222_vm1 = vcmask (!%p164_p2), 523264  }
   0x8   : > { %v893_v8 = vpack.c.bf16 (!%p164_p2), %v203_v5, %v202_v2  ;;  %v204_v9 = vld [vmem:[%s1176_s1 + $0x10] sm:$0xff] (!%p164_p2)  ;;  %v205_v10 = vld [vmem:[%s1176_s1 + $0x18] sm:$0xff] (!%p164_p2)  ;;  %796 = vmatprep.mubr.msk.f32.mxu0 (!%p164_p2), %vm949_vm0, %v950_v11  ;;  %821 = vmatprep.mubr.msk.f32.mxu1 (!%p164_p2), %vm949_vm0, %v950_v11  ;;  %v884_v12 = vpack.c.bf16 (!%p164_p2), %v699_v7, %v698_v6  ;;  %v700_v14 = vld [vmem:[%s1176_s1 + $0x60] sm:$0xff] (!%p164_p2) }
   0x9   : > { %882 = vmatpush3.bf16.msra.mxu0 (!%p164_p2), %v881_v4  ;;  %v896_v13 = vpack.c.bf16 (!%p164_p2), %v205_v10, %v204_v9  ;;  %v701_v15 = vld [vmem:[%s1176_s1 + $0x68] sm:$0xff] (!%p164_p2)  ;;  %v206_v16 = vld [vmem:[%s1176_s1 + $0x20] sm:$0xff] (!%p164_p2)  ;;  %v702_v20 = vld [vmem:[%s1176_s1 + $0x70] sm:$0xff] (!%p164_p2) }
   0xa   : > { %894 = vmatpush3.bf16.msra.mxu1 (!%p164_p2), %v893_v8  ;;  %883 = vmatprep.subr.bf16.mxu0 (!%p164_p2), %v948_v3  ;;  %v207_v17 = vld [vmem:[%s1176_s1 + $0x28] sm:$0xff] (!%p164_p2)  ;;  %v887_v18 = vpack.c.bf16 (!%p164_p2), %v701_v15, %v700_v14  ;;  %v703_v21 = vld [vmem:[%s1176_s1 + $0x78] sm:$0xff] (!%p164_p2)  ;;  %v208_v22 = vld [vmem:[%s1176_s1 + $0x30] sm:$0xff] (!%p164_p2) }
   0xb   : > { %895 = vmatprep.subr.bf16.mxu1 (!%p164_p2), %v948_v3  ;;  %v899_v19 = vpack.c.bf16 (!%p164_p2), %v207_v17, %v206_v16  ;;  %v209_v23 = vld [vmem:[%s1176_s1 + $0x38] sm:$0xff] (!%p164_p2)  ;;  %v890_v24 = vpack.c.bf16 (!%p164_p2), %v703_v21, %v702_v20  ;;  %v710_v26 = vld [vmem:[%s1176_s1 + $0x80] sm:$0xff] (!%p164_p2)  ;;  %v711_v27 = vld [vmem:[%s1176_s1 + $0x88] sm:$0xff] (!%p164_p2) }
   0xc   : > { %v902_v25 = vpack.c.bf16 (!%p164_p2), %v209_v23, %v208_v22  ;;  %v721_v28 = vld [vmem:[%s1176_s1 + $0xc0] sm:$0xff] (!%p164_p2)  ;;  %v722_v29 = vld [vmem:[%s1176_s1 + $0xc8] sm:$0xff] (!%p164_p2)  ;;  %v905_v31 = vpack.c.bf16 (!%p164_p2), %v711_v27, %v710_v26  ;;  %v712_v34 = vld [vmem:[%s1176_s1 + $0x90] sm:$0xff] (!%p164_p2) }
   0xd   : > { %885 = vmatpush3.bf16.msra.mxu0 (!%p164_p2), %v884_v12  ;;  %v917_v33 = vpack.c.bf16 (!%p164_p2), %v722_v29, %v721_v28  ;;  %v713_v35 = vld [vmem:[%s1176_s1 + $0x98] sm:$0xff] (!%p164_p2)  ;;  %v723_v36 = vld [vmem:[%s1176_s1 + $0xd0] sm:$0xff] (!%p164_p2)  ;;  %v714_v42 = vld [vmem:[%s1176_s1 + $0xa0] sm:$0xff] (!%p164_p2) }
   0xe   : > { %s1182_s18 = smov (!%p1009_p3, %s688_s18), 1  ;;  %897 = vmatpush3.bf16.msra.mxu1 %v896_v13  ;;  %886 = vmatprep.subr.bf16.mxu0 %v948_v3  ;;  %v724_v37 = vld [vmem:[%s1176_s1 + $0xd8] sm:$0xff]  ;;  %v908_v38 = vpack.c.bf16 %v713_v35, %v712_v34  ;;  %v715_v43 = vld [vmem:[%s1176_s1 + $0xa8] sm:$0xff]  ;;  %v725_v44 = vld [vmem:[%s1176_s1 + $0xe0] sm:$0xff] }
   0xf   : > { %898 = vmatprep.subr.bf16.mxu1 %v948_v3  ;;  %s735_s26 = sshll.u32 %s1182_s18, 5  ;;  %v920_v40 = vpack.c.bf16 %v724_v37, %v723_v36  ;;  %v726_v45 = vld [vmem:[%s1176_s1 + $0xe8] sm:$0xff]  ;;  %v911_v46 = vpack.c.bf16 %v715_v43, %v714_v42  ;;  %v716_v50 = vld [vmem:[%s1176_s1 + $0xb0] sm:$0xff]  ;;  %v717_v51 = vld [vmem:[%s1176_s1 + $0xb8] sm:$0xff]  ;;  %s928_s14 = smul.u32 24, %s1182_s18 }
  0x10   : > { %s1062_s29 = scalar_lea.vmem %s1175_s0, %s735_s26  ;;  %v923_v48 = vpack.c.bf16 %v726_v45, %v725_v44  ;;  %v727_v52 = vld [vmem:[%s1176_s1 + $0xf0] sm:$0xff]  ;;  %v728_v53 = vld [vmem:[%s1176_s1 + $0xf8] sm:$0xff]  ;;  %v914_v54 = vpack.c.bf16 %v717_v51, %v716_v50  ;;  %v732_v17 = vld [vmem:[%s1177_s2] ss:$0 sm:$0xff] }
  0x11   : > { %888 = vmatpush3.bf16.msra.mxu0 %v887_v18  ;;  %v210_v30 = vld [vmem:[%s1062_s29 + $0x1] sm:$0xff]  ;;  %v211_v39 = vld [vmem:[%s1062_s29 + $0x9] sm:$0xff]  ;;  %v212_v47 = vld [vmem:[%s1062_s29 + $0x11] sm:$0xf]  ;;  %v926_v55 = vpack.c.bf16 %v728_v53, %v727_v52  ;;  %s198_s19 = scalar_lea.vmem %s1179_s4, %s928_s14 }
  0x12   : > { %900 = vmatpush3.bf16.msra.mxu1 %v899_v19  ;;  %889 = vmatprep.subr.bf16.mxu0 %v948_v3  ;;  %v199_v32 = vld [vmem:[%s1062_s29] sm:$0xff]  ;;  %v200_v41 = vld [vmem:[%s1062_s29 + $0x8] sm:$0xff]  ;;  %v201_v49 = vld [vmem:[%s1062_s29 + $0x10] sm:$0xf] }
  0x13   : > { %901 = vmatprep.subr.bf16.mxu1 %v948_v3  ;;  %v401_v56 = vld [vmem:[%s1062_s29 + $0x5] sm:$0xff]  ;;  %v402_v58 = vld [vmem:[%s1062_s29 + $0xd] sm:$0xff]  ;;  %v403_v60 = vld [vmem:[%s1062_s29 + $0x15] sm:$0xf] }
  0x14   : > { %v505_v57 = vld [vmem:[%s1062_s29 + $0x6] sm:$0xff]  ;;  %v506_v59 = vld [vmem:[%s1062_s29 + $0xe] sm:$0xff]  ;;  %v507_v61 = vld [vmem:[%s1062_s29 + $0x16] sm:$0xf]  ;;  %s619_s29 = sld [smem:[#allocation2]] }
  0x15   : > { %891 = vmatpush3.bf16.msra.mxu0 %v890_v24 }
  0x16   : > { %903 = vmatpush3.bf16.msra.mxu1 %v902_v25  ;;  %904 = vmatprep.subr.bf16.mxu0 %v948_v3 }
  0x17   : > { %916 = vmatprep.subr.bf16.mxu1 %v948_v3 }
  0x18   : > { %797 = vmatmul.mubr.msk.f32.vlgmr.msra.gmra.mrb[0].mxu0 %vm222_vm1, %v210_v30 }
  0x19   : > { %822 = vmatmul.mubr.msk.f32.vlgmr.msra.gmra.mrb[0].mxu1 %vm222_vm1, %v199_v32  ;;  %906 = vmatpush3.bf16.msra.mxu0 %v905_v31 }
  0x1a   : > { %918 = vmatpush3.bf16.msra.mxu1 %v917_v33  ;;  %907 = vmatprep.subr.bf16.mxu0 %v948_v3  ;;  %v623_v20 = vstv %s619_s29 }
  0x1b   : > { %919 = vmatprep.subr.bf16.mxu1 %v948_v3  ;;  %799 = vmatprep.mubr.msk.f32.mxu0 %vm949_vm0, %v950_v11 }
  0x1c   : > { %800 = vmatmul.mubr.msk.f32.gmra.mrb[2].mxu0 %vm222_vm1, %v211_v39  ;;  %824 = vmatprep.mubr.msk.f32.mxu1 %vm949_vm0, %v950_v11 }
  0x1d   : > { %909 = vmatpush3.bf16.msra.mxu0 %v908_v38  ;;  %825 = vmatmul.mubr.msk.f32.gmra.mrb[2].mxu1 %vm222_vm1, %v200_v41 }
  0x1e   : > { %921 = vmatpush3.bf16.msra.mxu1 %v920_v40  ;;  %910 = vmatprep.subr.bf16.mxu0 %v948_v3 }
  0x1f   : > { %922 = vmatprep.subr.bf16.mxu1 %v948_v3  ;;  %802 = vmatprep.mubr.msk.f32.mxu0 %vm949_vm0, %v950_v11 }
  0x20   : > { %803 = vmatmul.mubr.msk.f32.gmra.mrb[4].mxu0 %vm222_vm1, %v212_v47  ;;  %827 = vmatprep.mubr.msk.f32.mxu1 %vm949_vm0, %v950_v11 }
  0x21   : > { %912 = vmatpush3.bf16.msra.mxu0 %v911_v46  ;;  %828 = vmatmul.mubr.msk.f32.gmra.mrb[4].mxu1 %vm222_vm1, %v201_v49 }
  0x22   : > { %924 = vmatpush3.bf16.msra.mxu1 %v923_v48  ;;  %913 = vmatprep.subr.bf16.mxu0 %v948_v3 }
  0x23   : > { %925 = vmatprep.subr.bf16.mxu1 %v948_v3  ;;  %846 = vmatprep.mubr.msk.f32.mxu0 %vm949_vm0, %v950_v11 }
  0x24   : > { %871 = vmatprep.mubr.msk.f32.mxu1 %vm949_vm0, %v950_v11 }
  0x25   : > { %915 = vmatpush3.bf16.msra.mxu0 %v914_v54 }
  0x26   : > { %927 = vmatpush3.bf16.msra.mxu1 %v926_v55 }
  0x28   : > { %847 = vmatmul.mubr.msk.f32.vlgmr.msra.gmra.mrb[6].mxu0 %vm222_vm1, %v401_v56 }
  0x29   : > { %872 = vmatmul.mubr.msk.f32.vlgmr.msra.gmra.mrb[6].mxu1 %vm222_vm1, %v505_v57  ;;  %849 = vmatprep.mubr.msk.f32.mxu0 %vm949_vm0, %v950_v11 }
  0x2a   : > { %874 = vmatprep.mubr.msk.f32.mxu1 %vm949_vm0, %v950_v11 }
  0x2c   : > { %850 = vmatmul.mubr.msk.f32.gmra.mrb[8].mxu0 %vm222_vm1, %v402_v58 }
  0x2d   : > { %875 = vmatmul.mubr.msk.f32.gmra.mrb[8].mxu1 %vm222_vm1, %v506_v59  ;;  %852 = vmatprep.mubr.msk.f32.mxu0 %vm949_vm0, %v950_v11 }
  0x2e   : > { %877 = vmatprep.mubr.msk.f32.mxu1 %vm949_vm0, %v950_v11 }
  0x30   : > { %853 = vmatmul.mubr.msk.f32.gmra.mrb[10].mxu0 %vm222_vm1, %v403_v60 }
  0x31   : > { %878 = vmatmul.mubr.msk.f32.gmra.mrb[10].mxu1 %vm222_vm1, %v507_v61 }
  0xeb   : > { %v298_v62 = vpop.f32.mrb[0].mxu0 }
  0xec   : > { %v798_v63 = vpop.f32.mrb[1].mxu0  ;;  %v387_v0 = vpop.f32.mrb[0].mxu1 }
  0xed   : > { %v388_v1 = vadd.f32 %v387_v0, %v298_v62  ;;  %v823_v2 = vpop.f32.mrb[1].mxu1 }
  0xef   : > { %v303_v3 = vpop.f32.mrb[2].mxu0 }
  0xf0   : > { %v801_v4 = vpop.f32.mrb[3].mxu0  ;;  %v392_v5 = vpop.f32.mrb[2].mxu1 }
  0xf1   : > { %v393_v6 = vadd.f32 %v392_v5, %v303_v3  ;;  %v826_v7 = vpop.f32.mrb[3].mxu1 }
  0xf3   : > { %v308_v8 = vpop.f32.mrb[4].mxu0 }
  0xf4   : > { %v804_v9 = vpop.f32.mrb[5].mxu0  ;;  %v397_v10 = vpop.f32.mrb[4].mxu1 }
  0xf5   : > { %v398_v11 = vadd.f32 %v397_v10, %v308_v8  ;;  %v829_v12 = vpop.f32.mrb[5].mxu1 }
  0xfb   : > { %v488_v13 = vpop.f32.mrb[6].mxu0 }
  0xfc   : > { %v502_v14 = vadd.f32 %v488_v13, %v388_v1  ;;  %v848_v15 = vpop.f32.mrb[7].mxu0  ;;  %v592_v16 = vpop.f32.mrb[6].mxu1 }
  0xfd   : > { %v873_v18 = vpop.f32.mrb[7].mxu1 }
  0xfe   : > { %v606_v19 = vadd.f32 %v592_v16, %v502_v14 }
  0xff   : > { %v493_v21 = vpop.f32.mrb[8].mxu0 }
 0x100   : > { %v616_v22 = vadd.f32 %v732_v17, %v606_v19  ;;  %v503_v23 = vadd.f32 %v493_v21, %v393_v6  ;;  %v851_v24 = vpop.f32.mrb[9].mxu0  ;;  %v597_v25 = vpop.f32.mrb[8].mxu1 }
 0x101   : > { %v876_v26 = vpop.f32.mrb[9].mxu1 }
 0x102   : > { %vm620_vm2 = vcmp.gt.f32.partialorder %v616_v22, 0.0  ;;  %v624_v27 = vmul.f32 %v623_v20, %v616_v22  ;;  %v607_v28 = vadd.f32 %v597_v25, %v503_v23 }
 0x103   : > { %v498_v29 = vpop.f32.mrb[10].mxu0 }
 0x104   : > { %v627_v30 = vsel %vm620_vm2, %v616_v22, %v624_v27  ;;  %v617_v31 = vadd.f32 %v732_v17, %v607_v28  ;;  %v504_v32 = vadd.f32 %v498_v29, %v398_v11  ;;  %v854_v33 = vpop.f32.mrb[11].mxu0  ;;  %v602_v34 = vpop.f32.mrb[10].mxu1 }
 0x105   : > { %630 = vst [vmem:[%s198_s19] sm:$0xff] %v627_v30  ;;  %v879_v35 = vpop.f32.mrb[11].mxu1 }
 0x106   : > { %vm621_vm3 = vcmp.gt.f32.partialorder %v617_v31, 0.0  ;;  %v625_v36 = vmul.f32 %v623_v20, %v617_v31  ;;  %v608_v37 = vadd.f32 %v602_v34, %v504_v32 }
 0x108   : > { %v628_v38 = vsel %vm621_vm3, %v617_v31, %v625_v36  ;;  %v618_v39 = vadd.f32 %v732_v17, %v608_v37 }
 0x109   : > { %631 = vst [vmem:[%s198_s19 + $0x8] sm:$0xff] %v628_v38 }
 0x10a   : > { %vm622_vm4 = vcmp.gt.f32.partialorder %v618_v39, 0.0  ;;  %v626_v40 = vmul.f32 %v623_v20, %v618_v39 }
 0x10c   : > { %v629_v41 = vsel %vm622_vm4, %v618_v39, %v626_v40 }
 0x10d   : > { %632 = vst [vmem:[%s198_s19 + $0x10] sm:$0xf] %v629_v41 }
 0x10e PF: > { %s15_s17 = sadd.s32 1, %s946_s17  }
 0x10f   : > { %p12_p4 = scmp.ge.s32.totalorder %s15_s17, 4  }
 0x111   :  { %14 = sbr.rel (!%p12_p4) target bundleno = 2 (0x2), region = 69 }

// kernel: tile.8
= control target key start
LH: loop header
LB: loop body
LE: loop exit
PB: predicated region body
PF: predicated region fallthrough
CT: control target
= control target key end

     0   :  { %s28_s0 = inlined_call_operand.vmem [shape: f32[4], index: 0, kind: input, shape index: {}]   ;;  %s29_s1 = inlined_call_operand.vmem [shape: f32[16,4], index: 1, kind: output, shape index: {}]  }
   0x1   :  { %v4_v0 = vld [vmem:[%s28_s0] ss:$0 sm:$0xff] }
   0x2   :  { %5 = vst [vmem:[%s29_s1] sm:$0xff] %v4_v0  ;;  %8 = vst [vmem:[%s29_s1 + $0x8] sm:$0xff] %v4_v0 }

// kernel: tile.9
= control target key start
LH: loop header
LB: loop body
LE: loop exit
PB: predicated region body
PF: predicated region fallthrough
CT: control target
= control target key end

     0   :  { %s131_s10 = smov 60   ;;  %s132_s11 = smov 52   ;;  %vm3_vm0 = vcmask 31744   ;;  %vm9_vm1 = vcmask 523744   ;;  %vm15_vm2 = vcmask 490944   ;;  %vm21_vm3 = vcmask 458144   ;;  %s207_s0 = inlined_call_operand.vmem [shape: f32[16,4], index: 0, kind: input, shape index: {}]   ;;  %s208_s1 = inlined_call_operand.vmem [shape: f32[64], index: 1, kind: output, shape index: {}]  }
   0x1   :  { %v101_v0 = vld [vmem:[%s207_s0 + $0xf] sm:$0x1]   ;;  %v103_v1 = vld [vmem:[%s207_s0 + $0xd] sm:$0x1]   ;;  %v102_v2 = vld [vmem:[%s207_s0 + $0xe] sm:$0x1]  }
   0x2   :  { %7 = vrot.lane.b32.xlu0 %v101_v0, %s131_s10  ;;  %19 = vrot.lane.b32.xlu1 %v103_v1, %s132_s11  ;;  %v104_v3 = vld [vmem:[%s207_s0 + $0xc] sm:$0x1]   ;;  %s133_s16 = smov 56   ;;  %s134_s17 = smov 48   ;;  %v105_v4 = vld [vmem:[%s207_s0 + $0xb] sm:$0x1]  }
   0x3   :  { %v106_v5 = vld [vmem:[%s207_s0 + $0xa] sm:$0x1]   ;;  %v2_v6 = vld [vmem:[%s207_s0] sm:$0x1]   ;;  %s135_s24 = smov 44   ;;  %s136_s25 = smov 40  }
   0x4   :  { %4 = vst.msk [vmem:[#allocation0] sm:$0x1] %vm3_vm0, %v2_v6   ;;  %v107_v7 = vld [vmem:[%s207_s0 + $0x9] sm:$0x1]   ;;  %v108_v8 = vld [vmem:[%s207_s0 + $0x8] sm:$0x1]  }
   0x5   :  { %s137_s30 = smov 36   ;;  %s138_s2 = smov 32   ;;  %v109_v9 = vld [vmem:[%s207_s0 + $0x7] sm:$0x1]   ;;  %v110_v10 = vld [vmem:[%s207_s0 + $0x6] sm:$0x1]  }
   0x6   :  { %13 = vrot.lane.b32.xlu0 %v102_v2, %s133_s16  ;;  %25 = vrot.lane.b32.xlu1 %v104_v3, %s134_s17  ;;  %s139_s7 = smov 28   ;;  %s140_s8 = smov 24   ;;  %v111_v11 = vld [vmem:[%s207_s0 + $0x5] sm:$0x1]   ;;  %v112_v12 = vld [vmem:[%s207_s0 + $0x4] sm:$0x1]  }
   0x7   :  { %s141_s13 = smov 20   ;;  %s142_s14 = smov 16   ;;  %v113_v13 = vld [vmem:[%s207_s0 + $0x3] sm:$0x1]   ;;  %v114_v14 = vld [vmem:[%s207_s0 + $0x2] sm:$0x1]  }
   0x8   :  { %s143_s19 = smov 12   ;;  %s144_s20 = smov 8   ;;  %v115_v15 = vld [vmem:[%s207_s0 + $0x1] sm:$0x1]   ;;  %vm27_vm4 = vcmask 425344   ;;  %vm33_vm5 = vcmask 392544  }
   0x9   :  { %s145_s0 = smov 4   ;;  %vm39_vm6 = vcmask 359744   ;;  %vm45_vm7 = vcmask 326944   ;;  %vm51_vm8 = vcmask 294144   ;;  %vm57_vm9 = vcmask 261344  }
   0xa   :  { %31 = vrot.lane.b32.xlu0 %v105_v4, %s135_s24  ;;  %37 = vrot.lane.b32.xlu1 %v106_v5, %s136_s25  ;;  %vm63_vm10 = vcmask 228544   ;;  %vm69_vm11 = vcmask 195744   ;;  %vm75_vm12 = vcmask 162944   ;;  %vm81_vm13 = vcmask 130144  }
   0xb   :  { %vm87_vm14 = vcmask 97344   ;;  %vm93_vm15 = vcmask 64544  }
   0xe   :  { %43 = vrot.lane.b32.xlu0 %v107_v7, %s137_s30  ;;  %49 = vrot.lane.b32.xlu1 %v108_v8, %s138_s2 }
  0x12   :  { %55 = vrot.lane.b32.xlu0 %v109_v9, %s139_s7  ;;  %61 = vrot.lane.b32.xlu1 %v110_v10, %s140_s8 }
  0x16   :  { %67 = vrot.lane.b32.xlu0 %v111_v11, %s141_s13  ;;  %73 = vrot.lane.b32.xlu1 %v112_v12, %s142_s14 }
  0x1a   :  { %79 = vrot.lane.b32.xlu0 %v113_v13, %s143_s19  ;;  %85 = vrot.lane.b32.xlu1 %v114_v14, %s144_s20 }
  0x1e   :  { %91 = vrot.lane.b32.xlu0 %v115_v15, %s145_s0 }
  0x74   :  { %v8_v16 = vpop.permute.xlu0 %7   ;;  %v20_v17 = vpop.permute.xlu1 %19  }
  0x75   :  { %10 = vst.msk [vmem:[#allocation0] sm:$0x1] %vm9_vm1, %v8_v16  }
  0x78   :  { %v14_v18 = vpop.permute.xlu0 %13   ;;  %v26_v19 = vpop.permute.xlu1 %25  }
  0x79   :  { %16 = vst.msk [vmem:[#allocation0] sm:$0x1] %vm15_vm2, %v14_v18  }
  0x7a   :  { %22 = vst.msk [vmem:[#allocation0] sm:$0x1] %vm21_vm3, %v20_v17  }
  0x7b   :  { %28 = vst.msk [vmem:[#allocation0] sm:$0x1] %vm27_vm4, %v26_v19  }
  0x7c   :  { %v32_v20 = vpop.permute.xlu0 %31   ;;  %v38_v21 = vpop.permute.xlu1 %37  }
  0x7d   :  { %34 = vst.msk [vmem:[#allocation0] sm:$0x1] %vm33_vm5, %v32_v20  }
  0x7e   :  { %40 = vst.msk [vmem:[#allocation0] sm:$0x1] %vm39_vm6, %v38_v21  }
  0x80   :  { %v44_v22 = vpop.permute.xlu0 %43   ;;  %v50_v23 = vpop.permute.xlu1 %49  }
  0x81   :  { %46 = vst.msk [vmem:[#allocation0] sm:$0x1] %vm45_vm7, %v44_v22  }
  0x82   :  { %52 = vst.msk [vmem:[#allocation0] sm:$0x1] %vm51_vm8, %v50_v23  }
  0x84   :  { %v56_v24 = vpop.permute.xlu0 %55   ;;  %v62_v25 = vpop.permute.xlu1 %61  }
  0x85   :  { %58 = vst.msk [vmem:[#allocation0] sm:$0x1] %vm57_vm9, %v56_v24  }
  0x86   :  { %64 = vst.msk [vmem:[#allocation0] sm:$0x1] %vm63_vm10, %v62_v25  }
  0x88   :  { %v68_v26 = vpop.permute.xlu0 %67   ;;  %v74_v27 = vpop.permute.xlu1 %73  }
  0x89   :  { %70 = vst.msk [vmem:[#allocation0] sm:$0x1] %vm69_vm11, %v68_v26  }
  0x8a   :  { %76 = vst.msk [vmem:[#allocation0] sm:$0x1] %vm75_vm12, %v74_v27  }
  0x8c   :  { %v80_v28 = vpop.permute.xlu0 %79   ;;  %v86_v29 = vpop.permute.xlu1 %85  }
  0x8d   :  { %82 = vst.msk [vmem:[#allocation0] sm:$0x1] %vm81_vm13, %v80_v28  }
  0x8e   :  { %88 = vst.msk [vmem:[#allocation0] sm:$0x1] %vm87_vm14, %v86_v29  }
  0x90   :  { %v92_v30 = vpop.permute.xlu0 %91  }
  0x91   :  { %94 = vst.msk [vmem:[#allocation0] sm:$0x1] %vm93_vm15, %v92_v30  }
  0x98   :  { %v98_v31 = vld [vmem:[#allocation0] sm:$0x1] }
  0x99   :  { %100 = vst [vmem:[%s208_s1] sm:$0x1] %v98_v31 }

// kernel: d_down_block.6
= control target key start
LH: loop header
LB: loop body
LE: loop exit
PB: predicated region body
PF: predicated region fallthrough
CT: control target
= control target key end

     0   :  { %s1414_s17 = smov 0   ;;  %s1591_s0 = inlined_call_operand.vmem [shape: f32[2,38,4], index: 0, kind: input, shape index: {}]   ;;  %s1592_s1 = inlined_call_operand.vmem [shape: f32[9,4,128], index: 1, kind: input, shape index: {}]   ;;  %s1593_s2 = inlined_call_operand.vmem [shape: f32[1,128], index: 2, kind: input, shape index: {}]   ;;  %s1594_s3 = inlined_call_operand.<no memory space> [shape: f32[1,1], index: 3, kind: input, shape index: {}]   ;;  %s1595_s4 = inlined_call_operand.vmem [shape: f32[2,24,128], index: 4, kind: output, shape index: {}]  }
   0x1   :  { %9 = sst [smem:[#allocation2]] %s1594_s3 }
   0x2 LB: > { %s1173_s18 = sadd.s32 4294967295, %s1382_s17   ;;  %p1177_p0 = scmp.ge.s32.totalorder %s1382_s17, 1  ;;  %s1382_s17 = sphi %s1414_s17, %s15_s17  }
   0x3   : > { %p163_p1 = scmp.lt.s32.totalorder %s1382_s17, 3 }
   0x5   : > { %p164_p2 = pnand %p1177_p0, %p163_p1 }
   0x6   : > { %v1180_v0 = vld [vmem:[%s1592_s1 + $0x4] sm:$0xf] (!%p164_p2)  ;;  %vm218_vm0 = vcmask (!%p164_p2), 1043456   ;;  %p189_p3 = scmp.lt.s32.totalorder (!%p164_p2), %s1173_s18, 1  ;;  %v1384_v1 = vmov (!%p164_p2), 0.0   ;;  %vm1385_vm1 = vmmov (!%p164_p2), 0  }
   0x7   : > { %167 = sbr.rel (%p164_p2) target bundleno = 293 (0x125), region = 36  ;;  %1362 = vmatprep.subr.mxu1 (!%p164_p2), %v1384_v1  ;;  %1268 = vmatprep.mubr.msk.f32.mxu1 (!%p164_p2), %vm1385_vm1, %v1384_v1  ;;  %vm208_vm2 = vcmask (!%p164_p2), 31744   ;;  %v202_v2 = vld [vmem:[%s1592_s1] sm:$0xf] (!%p164_p2)  ;;  %v1189_v5 = vld [vmem:[%s1592_s1 + $0x8] sm:$0xf] (!%p164_p2) }
   0x8   : > { %1363 = vmatpush3.msk.msra.mxu1 (!%p164_p2), %vm218_vm0, %v1180_v0  ;;  %1263 = vmatprep.subr.mxu0 (!%p164_p2), %v1384_v1  ;;  %v1199_v8 = vld [vmem:[%s1592_s1 + $0x10] sm:$0xf] (!%p164_p2)  ;;  %v1194_v11 = vld [vmem:[%s1592_s1 + $0xc] sm:$0xf] (!%p164_p2)  ;;  %v1209_v16 = vld [vmem:[%s1592_s1 + $0x18] sm:$0xf] (!%p164_p2) }
   0x9   : > { %1274 = vmatprep.subr.mxu1 (!%p164_p2), %v1384_v1  ;;  %1264 = vmatpush3.msk.msra.mxu0 (!%p164_p2), %vm218_vm0, %v1180_v0  ;;  %v1204_v19 = vld [vmem:[%s1592_s1 + $0x14] sm:$0xf] (!%p164_p2)  ;;  %v1219_v24 = vld [vmem:[%s1592_s1 + $0x20] sm:$0xf] (!%p164_p2)  ;;  %v1214_v26 = vld [vmem:[%s1592_s1 + $0x1c] sm:$0xf] (!%p164_p2) }
   0xa   : > { %1265 = vmatprep.mubr.msk.f32.mxu0 (!%p164_p2), %vm1385_vm1, %v1384_v1  ;;  %1285 = vmatprep.subr.mxu0 (!%p164_p2), %v1384_v1  ;;  %s1104_s14 = sld [smem:[#allocation2]] (!%p164_p2) }
   0xe   : > { %s1597_s18 = smov (!%p189_p3, %s1173_s18), 1 }
   0xf   : > { %s1364_s3 = smul.u32 40, %s1597_s18 }
  0x10   : > { %s1365_s19 = smul.u32 24, %s1597_s18 }
  0x11   : > { %s1441_s23 = scalar_lea.vmem %s1591_s0, %s1364_s3 }
  0x12   : > { %v204_v3 = vld [vmem:[%s1441_s23 + $0x9] sm:$0xff]  ;;  %v203_v4 = vld [vmem:[%s1441_s23 + $0x1] sm:$0xff]  ;;  %v205_v6 = vld [vmem:[%s1441_s23 + $0x11] sm:$0xff]  ;;  %s198_s21 = scalar_lea.vmem %s1595_s4, %s1365_s19 }
  0x13   : > { %1269 = vmatmul.mubr.msk.f32.vlgmr.msra.gmra.mrb[0].mxu1 %vm208_vm2, %v204_v3  ;;  %1266 = vmatmul.mubr.msk.f32.vlgmr.msra.gmra.mrb[0].mxu0 %vm208_vm2, %v203_v4  ;;  %v394_v7 = vld [vmem:[%s1441_s23 + $0x2] sm:$0xff]  ;;  %v395_v10 = vld [vmem:[%s1441_s23 + $0xa] sm:$0xff]  ;;  %v396_v13 = vld [vmem:[%s1441_s23 + $0x12] sm:$0xff] }
  0x14   : > { %1275 = vmatpush3.msk.msra.mxu1 %vm218_vm0, %v202_v2  ;;  %1271 = vmatprep.mubr.msk.f32.mxu1 %vm1385_vm1, %v1384_v1  ;;  %v199_v9 = vld [vmem:[%s1441_s23] sm:$0xff]  ;;  %v200_v12 = vld [vmem:[%s1441_s23 + $0x8] sm:$0xff]  ;;  %v201_v14 = vld [vmem:[%s1441_s23 + $0x10] sm:$0xff] }
  0x15   : > { %1286 = vmatpush3.msk.msra.mxu0 %vm218_vm0, %v1189_v5  ;;  %1296 = vmatprep.subr.mxu1 %v1384_v1  ;;  %v594_v15 = vld [vmem:[%s1441_s23 + $0x7] sm:$0xff]  ;;  %v595_v18 = vld [vmem:[%s1441_s23 + $0xf] sm:$0xff]  ;;  %v596_v21 = vld [vmem:[%s1441_s23 + $0x17] sm:$0xff] }
  0x16   : > { %1287 = vmatprep.mubr.msk.f32.mxu0 %vm1385_vm1, %v1384_v1  ;;  %1307 = vmatprep.subr.mxu0 %v1384_v1  ;;  %v494_v17 = vld [vmem:[%s1441_s23 + $0x6] sm:$0xff]  ;;  %v495_v20 = vld [vmem:[%s1441_s23 + $0xe] sm:$0xff]  ;;  %v496_v22 = vld [vmem:[%s1441_s23 + $0x16] sm:$0xff] }
  0x17   : > { %1272 = vmatmul.mubr.msk.f32.gmra.mrb[2].mxu1 %vm208_vm2, %v205_v6  ;;  %1288 = vmatmul.mubr.msk.f32.vlgmr.msra.gmra.mrb[2].mxu0 %vm208_vm2, %v394_v7  ;;  %v794_v23 = vld [vmem:[%s1441_s23 + $0xc] sm:$0xff]  ;;  %v795_v25 = vld [vmem:[%s1441_s23 + $0x14] sm:$0xff]  ;;  %v796_v27 = vld [vmem:[%s1441_s23 + $0x1c] sm:$0xff] }
  0x18   : > { %1276 = vmatprep.mubr.msk.f32.mxu1 %vm1385_vm1, %v1384_v1  ;;  %1308 = vmatpush3.msk.msra.mxu0 %vm218_vm0, %v1199_v8  ;;  %v696_v28 = vld [vmem:[%s1441_s23 + $0x18] sm:$0xff]  ;;  %v894_v29 = vld [vmem:[%s1441_s23 + $0xd] sm:$0xff] }
  0x19   : > { %1290 = vmatprep.mubr.msk.f32.mxu0 %vm1385_vm1, %v1384_v1  ;;  %1329 = vmatprep.subr.mxu0 %v1384_v1  ;;  %v895_v30 = vld [vmem:[%s1441_s23 + $0x15] sm:$0xff]  ;;  %v996_v31 = vld [vmem:[%s1441_s23 + $0x1e] sm:$0xff] }
  0x1a   : > { %v896_v32 = vld [vmem:[%s1441_s23 + $0x1d] sm:$0xff] }
  0x1b   : > { %1277 = vmatmul.mubr.msk.f32.vlgmr.msra.gmra.mrb[4].mxu1 %vm208_vm2, %v199_v9  ;;  %1291 = vmatmul.mubr.msk.f32.gmra.mrb[4].mxu0 %vm208_vm2, %v395_v10 }
  0x1c   : > { %1297 = vmatpush3.msk.msra.mxu1 %vm218_vm0, %v1194_v11  ;;  %1279 = vmatprep.mubr.msk.f32.mxu1 %vm1385_vm1, %v1384_v1 }
  0x1d   : > { %1293 = vmatprep.mubr.msk.f32.mxu0 %vm1385_vm1, %v1384_v1  ;;  %1318 = vmatprep.subr.mxu1 %v1384_v1 }
  0x1f   : > { %1280 = vmatmul.mubr.msk.f32.gmra.mrb[6].mxu1 %vm208_vm2, %v200_v12  ;;  %1294 = vmatmul.mubr.msk.f32.gmra.mrb[6].mxu0 %vm208_vm2, %v396_v13 }
  0x20   : > { %1282 = vmatprep.mubr.msk.f32.mxu1 %vm1385_vm1, %v1384_v1  ;;  %1309 = vmatprep.mubr.msk.f32.mxu0 %vm1385_vm1, %v1384_v1 }
  0x23   : > { %1283 = vmatmul.mubr.msk.f32.gmra.mrb[8].mxu1 %vm208_vm2, %v201_v14  ;;  %1310 = vmatmul.mubr.msk.f32.vlgmr.msra.gmra.mrb[8].mxu0 %vm208_vm2, %v594_v15 }
  0x24   : > { %1298 = vmatprep.mubr.msk.f32.mxu1 %vm1385_vm1, %v1384_v1  ;;  %1330 = vmatpush3.msk.msra.mxu0 %vm218_vm0, %v1209_v16 }
  0x25   : > { %1312 = vmatprep.mubr.msk.f32.mxu0 %vm1385_vm1, %v1384_v1  ;;  %1351 = vmatprep.subr.mxu0 %v1384_v1 }
  0x27   : > { %1299 = vmatmul.mubr.msk.f32.vlgmr.msra.gmra.mrb[10].mxu1 %vm208_vm2, %v494_v17  ;;  %1313 = vmatmul.mubr.msk.f32.gmra.mrb[10].mxu0 %vm208_vm2, %v595_v18 }
  0x28   : > { %1319 = vmatpush3.msk.msra.mxu1 %vm218_vm0, %v1204_v19  ;;  %1301 = vmatprep.mubr.msk.f32.mxu1 %vm1385_vm1, %v1384_v1 }
  0x29   : > { %1315 = vmatprep.mubr.msk.f32.mxu0 %vm1385_vm1, %v1384_v1  ;;  %1340 = vmatprep.subr.mxu1 %v1384_v1 }
  0x2b   : > { %1302 = vmatmul.mubr.msk.f32.gmra.mrb[12].mxu1 %vm208_vm2, %v495_v20  ;;  %1316 = vmatmul.mubr.msk.f32.gmra.mrb[12].mxu0 %vm208_vm2, %v596_v21 }
  0x2c   : > { %1304 = vmatprep.mubr.msk.f32.mxu1 %vm1385_vm1, %v1384_v1  ;;  %1331 = vmatprep.mubr.msk.f32.mxu0 %vm1385_vm1, %v1384_v1 }
  0x2f   : > { %1305 = vmatmul.mubr.msk.f32.gmra.mrb[14].mxu1 %vm208_vm2, %v496_v22  ;;  %1332 = vmatmul.mubr.msk.f32.vlgmr.msra.gmra.mrb[14].mxu0 %vm208_vm2, %v794_v23 }
  0x30   : > { %1320 = vmatprep.mubr.msk.f32.mxu1 %vm1385_vm1, %v1384_v1  ;;  %1352 = vmatpush3.msk.msra.mxu0 %vm218_vm0, %v1219_v24 }
  0x31   : > { %1334 = vmatprep.mubr.msk.f32.mxu0 %vm1385_vm1, %v1384_v1 }
  0x33   : > { %1321 = vmatmul.mubr.msk.f32.vlgmr.msra.gmra.mrb[16].mxu1 %vm208_vm2, %v200_v12  ;;  %1335 = vmatmul.mubr.msk.f32.gmra.mrb[16].mxu0 %vm208_vm2, %v795_v25 }
  0x34   : > { %1341 = vmatpush3.msk.msra.mxu1 %vm218_vm0, %v1214_v26  ;;  %1323 = vmatprep.mubr.msk.f32.mxu1 %vm1385_vm1, %v1384_v1 }
  0x35   : > { %1337 = vmatprep.mubr.msk.f32.mxu0 %vm1385_vm1, %v1384_v1 }
  0x37   : > { %1324 = vmatmul.mubr.msk.f32.gmra.mrb[18].mxu1 %vm208_vm2, %v201_v14  ;;  %1338 = vmatmul.mubr.msk.f32.gmra.mrb[18].mxu0 %vm208_vm2, %v796_v27 }
  0x38   : > { %1326 = vmatprep.mubr.msk.f32.mxu1 %vm1385_vm1, %v1384_v1  ;;  %1353 = vmatprep.mubr.msk.f32.mxu0 %vm1385_vm1, %v1384_v1 }
  0x3b   : > { %1327 = vmatmul.mubr.msk.f32.gmra.mrb[20].mxu1 %vm208_vm2, %v696_v28  ;;  %1354 = vmatmul.mubr.msk.f32.vlgmr.msra.gmra.mrb[20].mxu0 %vm208_vm2, %v495_v20 }
  0x3c   : > { %1342 = vmatprep.mubr.msk.f32.mxu1 %vm1385_vm1, %v1384_v1  ;;  %1356 = vmatprep.mubr.msk.f32.mxu0 %vm1385_vm1, %v1384_v1 }
  0x3f   : > { %1343 = vmatmul.mubr.msk.f32.vlgmr.msra.gmra.mrb[22].mxu1 %vm208_vm2, %v894_v29  ;;  %1357 = vmatmul.mubr.msk.f32.gmra.mrb[22].mxu0 %vm208_vm2, %v496_v22 }
  0x40   : > { %1345 = vmatprep.mubr.msk.f32.mxu1 %vm1385_vm1, %v1384_v1  ;;  %1359 = vmatprep.mubr.msk.f32.mxu0 %vm1385_vm1, %v1384_v1 }
  0x43   : > { %1346 = vmatmul.mubr.msk.f32.gmra.mrb[24].mxu1 %vm208_vm2, %v895_v30  ;;  %1360 = vmatmul.mubr.msk.f32.gmra.mrb[24].mxu0 %vm208_vm2, %v996_v31 }
  0x44   : > { %1348 = vmatprep.mubr.msk.f32.mxu1 %vm1385_vm1, %v1384_v1 }
  0x47   : > { %1349 = vmatmul.mubr.msk.f32.gmra.mrb[26].mxu1 %vm208_vm2, %v896_v32 }
  0xe6   : > { %v293_v33 = vpop.f32.mrb[0].mxu1  ;;  %v288_v34 = vpop.f32.mrb[0].mxu0 }
  0xe7   : > { %v1270_v35 = vpop.f32.mrb[1].mxu1  ;;  %v1267_v36 = vpop.f32.mrb[1].mxu0 }
  0xe8   : > { %v1224_v36 = vld [vmem:[%s1593_s2] ss:$0 sm:$0xff] }
  0xea   : > { %v298_v37 = vpop.f32.mrb[2].mxu1  ;;  %v477_v38 = vpop.f32.mrb[2].mxu0 }
  0xeb   : > { %v1273_v39 = vpop.f32.mrb[3].mxu1  ;;  %v1289_v40 = vpop.f32.mrb[3].mxu0 }
  0xee   : > { %v380_v41 = vpop.f32.mrb[4].mxu1  ;;  %v482_v42 = vpop.f32.mrb[4].mxu0 }
  0xef   : > { %v381_v43 = vadd.f32 %v380_v41, %v288_v34  ;;  %v1278_v44 = vpop.f32.mrb[5].mxu1  ;;  %v1292_v45 = vpop.f32.mrb[5].mxu0 }
  0xf1   : > { %v491_v46 = vadd.f32 %v477_v38, %v381_v43  ;;  %v1108_v38 = vstv %s1104_s14 }
  0xf2   : > { %v385_v47 = vpop.f32.mrb[6].mxu1  ;;  %v487_v48 = vpop.f32.mrb[6].mxu0 }
  0xf3   : > { %v386_v49 = vadd.f32 %v385_v47, %v293_v33  ;;  %v1281_v50 = vpop.f32.mrb[7].mxu1  ;;  %v1295_v51 = vpop.f32.mrb[7].mxu0 }
  0xf5   : > { %v492_v52 = vadd.f32 %v482_v42, %v386_v49 }
  0xf6   : > { %v390_v53 = vpop.f32.mrb[8].mxu1  ;;  %v677_v54 = vpop.f32.mrb[8].mxu0 }
  0xf7   : > { %v391_v55 = vadd.f32 %v390_v53, %v298_v37  ;;  %v1284_v56 = vpop.f32.mrb[9].mxu1  ;;  %v1311_v57 = vpop.f32.mrb[9].mxu0 }
  0xf9   : > { %v493_v58 = vadd.f32 %v487_v48, %v391_v55 }
  0xfa   : > { %v577_v59 = vpop.f32.mrb[10].mxu1  ;;  %v682_v60 = vpop.f32.mrb[10].mxu0 }
  0xfb   : > { %v591_v61 = vadd.f32 %v577_v59, %v491_v46  ;;  %v1300_v62 = vpop.f32.mrb[11].mxu1  ;;  %v1314_v63 = vpop.f32.mrb[11].mxu0 }
  0xfd   : > { %v691_v0 = vadd.f32 %v677_v54, %v591_v61 }
  0xfe   : > { %v582_v1 = vpop.f32.mrb[12].mxu1  ;;  %v687_v2 = vpop.f32.mrb[12].mxu0 }
  0xff   : > { %v592_v3 = vadd.f32 %v582_v1, %v492_v52  ;;  %v1303_v4 = vpop.f32.mrb[13].mxu1  ;;  %v1317_v5 = vpop.f32.mrb[13].mxu0 }
 0x101   : > { %v692_v6 = vadd.f32 %v682_v60, %v592_v3 }
 0x102   : > { %v587_v7 = vpop.f32.mrb[14].mxu1  ;;  %v877_v8 = vpop.f32.mrb[14].mxu0 }
 0x103   : > { %v593_v9 = vadd.f32 %v587_v7, %v493_v58  ;;  %v1306_v10 = vpop.f32.mrb[15].mxu1  ;;  %v1333_v11 = vpop.f32.mrb[15].mxu0 }
 0x105   : > { %v693_v12 = vadd.f32 %v687_v2, %v593_v9 }
 0x106   : > { %v777_v13 = vpop.f32.mrb[16].mxu1  ;;  %v882_v14 = vpop.f32.mrb[16].mxu0 }
 0x107   : > { %v791_v15 = vadd.f32 %v777_v13, %v691_v0  ;;  %v1322_v16 = vpop.f32.mrb[17].mxu1  ;;  %v1336_v17 = vpop.f32.mrb[17].mxu0 }
 0x109   : > { %v891_v18 = vadd.f32 %v877_v8, %v791_v15 }
 0x10a   : > { %v782_v19 = vpop.f32.mrb[18].mxu1  ;;  %v887_v20 = vpop.f32.mrb[18].mxu0 }
 0x10b   : > { %v792_v21 = vadd.f32 %v782_v19, %v692_v6  ;;  %v1325_v22 = vpop.f32.mrb[19].mxu1  ;;  %v1339_v23 = vpop.f32.mrb[19].mxu0 }
 0x10d   : > { %v892_v24 = vadd.f32 %v882_v14, %v792_v21 }
 0x10e   : > { %v787_v25 = vpop.f32.mrb[20].mxu1  ;;  %v1077_v26 = vpop.f32.mrb[20].mxu0 }
 0x10f   : > { %v793_v27 = vadd.f32 %v787_v25, %v693_v12  ;;  %v1328_v28 = vpop.f32.mrb[21].mxu1  ;;  %v1355_v29 = vpop.f32.mrb[21].mxu0 }
 0x111   : > { %v893_v30 = vadd.f32 %v887_v20, %v793_v27 }
 0x112   : > { %v977_v31 = vpop.f32.mrb[22].mxu1  ;;  %v1082_v32 = vpop.f32.mrb[22].mxu0 }
 0x113   : > { %v991_v33 = vadd.f32 %v977_v31, %v891_v18  ;;  %v1344_v34 = vpop.f32.mrb[23].mxu1  ;;  %v1358_v35 = vpop.f32.mrb[23].mxu0 }
 0x115   : > { %v1091_v37 = vadd.f32 %v1077_v26, %v991_v33 }
 0x116   : > { %v982_v39 = vpop.f32.mrb[24].mxu1  ;;  %v1087_v40 = vpop.f32.mrb[24].mxu0 }
 0x117   : > { %v1101_v41 = vadd.f32 %v1224_v36, %v1091_v37  ;;  %v992_v42 = vadd.f32 %v982_v39, %v892_v24  ;;  %v1347_v43 = vpop.f32.mrb[25].mxu1  ;;  %v1361_v44 = vpop.f32.mrb[25].mxu0 }
 0x119   : > { %vm1105_vm3 = vcmp.gt.f32.partialorder %v1101_v41, 0.0  ;;  %v1109_v45 = vmul.f32 %v1108_v38, %v1101_v41  ;;  %v1092_v46 = vadd.f32 %v1082_v32, %v992_v42 }
 0x11a   : > { %v987_v47 = vpop.f32.mrb[26].mxu1 }
 0x11b   : > { %v1112_v48 = vsel %vm1105_vm3, %v1101_v41, %v1109_v45  ;;  %v1102_v49 = vadd.f32 %v1224_v36, %v1092_v46  ;;  %v993_v50 = vadd.f32 %v987_v47, %v893_v30  ;;  %v1350_v51 = vpop.f32.mrb[27].mxu1 }
 0x11c   : > { %1115 = vst [vmem:[%s198_s21] sm:$0xff] %v1112_v48 }
 0x11d   : > { %vm1106_vm4 = vcmp.gt.f32.partialorder %v1102_v49, 0.0  ;;  %v1110_v52 = vmul.f32 %v1108_v38, %v1102_v49  ;;  %v1093_v53 = vadd.f32 %v1087_v40, %v993_v50 }
 0x11f   : > { %v1113_v54 = vsel %vm1106_vm4, %v1102_v49, %v1110_v52  ;;  %v1103_v55 = vadd.f32 %v1224_v36, %v1093_v53 }
 0x120   : > { %1116 = vst [vmem:[%s198_s21 + $0x8] sm:$0xff] %v1113_v54 }
 0x121   : > { %vm1107_vm5 = vcmp.gt.f32.partialorder %v1103_v55, 0.0  ;;  %v1111_v56 = vmul.f32 %v1108_v38, %v1103_v55 }
 0x123   : > { %v1114_v57 = vsel %vm1107_vm5, %v1103_v55, %v1111_v56 }
 0x124   : > { %1117 = vst [vmem:[%s198_s21 + $0x10] sm:$0xff] %v1114_v57 }
 0x125 PF: > { %s15_s17 = sadd.s32 1, %s1382_s17  }
 0x126   : > { %p12_p4 = scmp.ge.s32.totalorder %s15_s17, 4  }
 0x128   :  { %14 = sbr.rel (!%p12_p4) target bundleno = 2 (0x2), region = 74 }

// kernel: sub.1
= control target key start
LH: loop header
LB: loop body
LE: loop exit
PB: predicated region body
PF: predicated region fallthrough
CT: control target
= control target key end

     0   :  { %s716_s0 = inlined_call_operand.vmem [shape: f32[2,16,16,4], index: 0, kind: input, shape index: {}]   ;;  %s717_s1 = inlined_call_operand.vmem [shape: f32[2,16,16,4], index: 1, kind: input, shape index: {}]   ;;  %s718_s2 = inlined_call_operand.vmem [shape: f32[2,16,16,4], index: 2, kind: output, shape index: {}]  }
   0x1   :  { %v3_v0 = vld [vmem:[%s716_s0] sm:$0xf]  ;;  %v323_v5 = vld [vmem:[%s716_s0 + $0x4] sm:$0xf]  ;;  %v329_v11 = vld [vmem:[%s716_s0 + $0x8] sm:$0xf] }
   0x2   :  { %v4_v1 = vld [vmem:[%s717_s1] sm:$0xf]  ;;  %v324_v6 = vld [vmem:[%s717_s1 + $0x4] sm:$0xf]  ;;  %v330_v13 = vld [vmem:[%s717_s1 + $0x8] sm:$0xf] }
   0x3   :  { %v320_v2 = vld [vmem:[%s716_s0 + $0x40] sm:$0xf]  ;;  %v7_v3 = vsub.f32 %v3_v0, %v4_v1  ;;  %v26_v8 = vsub.f32 %v323_v5, %v324_v6  ;;  %v326_v9 = vld [vmem:[%s716_s0 + $0x44] sm:$0xf]  ;;  %v332_v14 = vld [vmem:[%s716_s0 + $0x48] sm:$0xf]  ;;  %v46_v16 = vsub.f32 %v329_v11, %v330_v13 }
   0x4   :  { %v321_v4 = vld [vmem:[%s717_s1 + $0x40] sm:$0xf]  ;;  %v327_v10 = vld [vmem:[%s717_s1 + $0x44] sm:$0xf]  ;;  %v333_v15 = vld [vmem:[%s717_s1 + $0x48] sm:$0xf] }
   0x5   :  { %v16_v7 = vsub.f32 %v320_v2, %v321_v4  ;;  %9 = vst [vmem:[%s718_s2] sm:$0xf] %v7_v3  ;;  %v36_v12 = vsub.f32 %v326_v9, %v327_v10  ;;  %325 = vst [vmem:[%s718_s2 + $0x4] sm:$0xf] %v26_v8  ;;  %v56_v17 = vsub.f32 %v332_v14, %v333_v15  ;;  %v335_v18 = vld [vmem:[%s716_s0 + $0xc] sm:$0xf] }
   0x6   :  { %v336_v19 = vld [vmem:[%s717_s1 + $0xc] sm:$0xf]  ;;  %v341_v23 = vld [vmem:[%s716_s0 + $0x10] sm:$0xf]  ;;  %331 = vst [vmem:[%s718_s2 + $0x8] sm:$0xf] %v46_v16 }
   0x7   :  { %322 = vst [vmem:[%s718_s2 + $0x40] sm:$0xf] %v16_v7  ;;  %v338_v20 = vld [vmem:[%s716_s0 + $0x4c] sm:$0xf]  ;;  %328 = vst [vmem:[%s718_s2 + $0x44] sm:$0xf] %v36_v12  ;;  %v66_v21 = vsub.f32 %v335_v18, %v336_v19 }
   0x8   :  { %v339_v22 = vld [vmem:[%s717_s1 + $0x4c] sm:$0xf]  ;;  %v342_v24 = vld [vmem:[%s717_s1 + $0x10] sm:$0xf]  ;;  %334 = vst [vmem:[%s718_s2 + $0x48] sm:$0xf] %v56_v17 }
   0x9   :  { %v76_v25 = vsub.f32 %v338_v20, %v339_v22  ;;  %v86_v26 = vsub.f32 %v341_v23, %v342_v24  ;;  %v344_v27 = vld [vmem:[%s716_s0 + $0x50] sm:$0xf]  ;;  %v347_v29 = vld [vmem:[%s716_s0 + $0x14] sm:$0xf]  ;;  %337 = vst [vmem:[%s718_s2 + $0xc] sm:$0xf] %v66_v21 }
   0xa   :  { %v345_v28 = vld [vmem:[%s717_s1 + $0x50] sm:$0xf]  ;;  %v348_v31 = vld [vmem:[%s717_s1 + $0x14] sm:$0xf]  ;;  %v353_v36 = vld [vmem:[%s716_s0 + $0x18] sm:$0xf] }
   0xb   :  { %v96_v30 = vsub.f32 %v344_v27, %v345_v28  ;;  %v350_v32 = vld [vmem:[%s716_s0 + $0x54] sm:$0xf]  ;;  %340 = vst [vmem:[%s718_s2 + $0x4c] sm:$0xf] %v76_v25  ;;  %343 = vst [vmem:[%s718_s2 + $0x10] sm:$0xf] %v86_v26  ;;  %v106_v34 = vsub.f32 %v347_v29, %v348_v31 }
   0xc   :  { %v351_v33 = vld [vmem:[%s717_s1 + $0x54] sm:$0xf]  ;;  %v354_v37 = vld [vmem:[%s717_s1 + $0x18] sm:$0xf]  ;;  %v359_v41 = vld [vmem:[%s716_s0 + $0x1c] sm:$0xf] }
   0xd   :  { %v116_v35 = vsub.f32 %v350_v32, %v351_v33  ;;  %v356_v38 = vld [vmem:[%s716_s0 + $0x58] sm:$0xf]  ;;  %346 = vst [vmem:[%s718_s2 + $0x50] sm:$0xf] %v96_v30  ;;  %v126_v39 = vsub.f32 %v353_v36, %v354_v37  ;;  %v360_v42 = vld [vmem:[%s717_s1 + $0x1c] sm:$0xf] }
   0xe   :  { %v357_v40 = vld [vmem:[%s717_s1 + $0x58] sm:$0xf]  ;;  %349 = vst [vmem:[%s718_s2 + $0x14] sm:$0xf] %v106_v34  ;;  %v146_v44 = vsub.f32 %v359_v41, %v360_v42  ;;  %v362_v45 = vld [vmem:[%s716_s0 + $0x5c] sm:$0xf] }
   0xf   :  { %352 = vst [vmem:[%s718_s2 + $0x54] sm:$0xf] %v116_v35  ;;  %v136_v43 = vsub.f32 %v356_v38, %v357_v40  ;;  %v363_v46 = vld [vmem:[%s717_s1 + $0x5c] sm:$0xf]  ;;  %v365_v47 = vld [vmem:[%s716_s0 + $0x20] sm:$0xf] }
  0x10   :  { %355 = vst [vmem:[%s718_s2 + $0x18] sm:$0xf] %v126_v39  ;;  %v156_v48 = vsub.f32 %v362_v45, %v363_v46  ;;  %v366_v49 = vld [vmem:[%s717_s1 + $0x20] sm:$0xf]  ;;  %361 = vst [vmem:[%s718_s2 + $0x1c] sm:$0xf] %v146_v44 }
  0x11   :  { %v368_v50 = vld [vmem:[%s716_s0 + $0x60] sm:$0xf]  ;;  %358 = vst [vmem:[%s718_s2 + $0x58] sm:$0xf] %v136_v43  ;;  %v166_v52 = vsub.f32 %v365_v47, %v366_v49  ;;  %v371_v54 = vld [vmem:[%s716_s0 + $0x24] sm:$0xf] }
  0x12   :  { %v369_v51 = vld [vmem:[%s717_s1 + $0x60] sm:$0xf]  ;;  %v372_v55 = vld [vmem:[%s717_s1 + $0x24] sm:$0xf]  ;;  %364 = vst [vmem:[%s718_s2 + $0x5c] sm:$0xf] %v156_v48 }
  0x13   :  { %v176_v53 = vsub.f32 %v368_v50, %v369_v51  ;;  %v374_v56 = vld [vmem:[%s716_s0 + $0x64] sm:$0xf]  ;;  %v186_v57 = vsub.f32 %v371_v54, %v372_v55  ;;  %v377_v59 = vld [vmem:[%s716_s0 + $0x28] sm:$0xf]  ;;  %367 = vst [vmem:[%s718_s2 + $0x20] sm:$0xf] %v166_v52 }
  0x14   :  { %v375_v58 = vld [vmem:[%s717_s1 + $0x64] sm:$0xf]  ;;  %v378_v60 = vld [vmem:[%s717_s1 + $0x28] sm:$0xf]  ;;  %v383_v1 = vld [vmem:[%s716_s0 + $0x2c] sm:$0xf] }
  0x15   :  { %370 = vst [vmem:[%s718_s2 + $0x60] sm:$0xf] %v176_v53  ;;  %v196_v61 = vsub.f32 %v374_v56, %v375_v58  ;;  %v206_v62 = vsub.f32 %v377_v59, %v378_v60  ;;  %v380_v63 = vld [vmem:[%s716_s0 + $0x68] sm:$0xf]  ;;  %373 = vst [vmem:[%s718_s2 + $0x24] sm:$0xf] %v186_v57 }
  0x16   :  { %v381_v0 = vld [vmem:[%s717_s1 + $0x68] sm:$0xf]  ;;  %v384_v3 = vld [vmem:[%s717_s1 + $0x2c] sm:$0xf]  ;;  %v389_v8 = vld [vmem:[%s716_s0 + $0x30] sm:$0xf] }
  0x17   :  { %v216_v2 = vsub.f32 %v380_v63, %v381_v0  ;;  %v386_v4 = vld [vmem:[%s716_s0 + $0x6c] sm:$0xf]  ;;  %376 = vst [vmem:[%s718_s2 + $0x64] sm:$0xf] %v196_v61  ;;  %379 = vst [vmem:[%s718_s2 + $0x28] sm:$0xf] %v206_v62  ;;  %v226_v6 = vsub.f32 %v383_v1, %v384_v3 }
  0x18   :  { %v387_v5 = vld [vmem:[%s717_s1 + $0x6c] sm:$0xf]  ;;  %v390_v9 = vld [vmem:[%s717_s1 + $0x30] sm:$0xf]  ;;  %v395_v13 = vld [vmem:[%s716_s0 + $0x34] sm:$0xf] }
  0x19   :  { %v236_v7 = vsub.f32 %v386_v4, %v387_v5  ;;  %v392_v10 = vld [vmem:[%s716_s0 + $0x70] sm:$0xf]  ;;  %382 = vst [vmem:[%s718_s2 + $0x68] sm:$0xf] %v216_v2  ;;  %v246_v11 = vsub.f32 %v389_v8, %v390_v9  ;;  %v396_v14 = vld [vmem:[%s717_s1 + $0x34] sm:$0xf] }
  0x1a   :  { %v393_v12 = vld [vmem:[%s717_s1 + $0x70] sm:$0xf]  ;;  %385 = vst [vmem:[%s718_s2 + $0x2c] sm:$0xf] %v226_v6  ;;  %v266_v16 = vsub.f32 %v395_v13, %v396_v14  ;;  %v398_v17 = vld [vmem:[%s716_s0 + $0x74] sm:$0xf] }
  0x1b   :  { %388 = vst [vmem:[%s718_s2 + $0x6c] sm:$0xf] %v236_v7  ;;  %v256_v15 = vsub.f32 %v392_v10, %v393_v12  ;;  %v399_v18 = vld [vmem:[%s717_s1 + $0x74] sm:$0xf]  ;;  %v401_v19 = vld [vmem:[%s716_s0 + $0x38] sm:$0xf] }
  0x1c   :  { %391 = vst [vmem:[%s718_s2 + $0x30] sm:$0xf] %v246_v11  ;;  %v276_v20 = vsub.f32 %v398_v17, %v399_v18  ;;  %v402_v21 = vld [vmem:[%s717_s1 + $0x38] sm:$0xf]  ;;  %397 = vst [vmem:[%s718_s2 + $0x34] sm:$0xf] %v266_v16 }
  0x1d   :  { %v404_v22 = vld [vmem:[%s716_s0 + $0x78] sm:$0xf]  ;;  %394 = vst [vmem:[%s718_s2 + $0x70] sm:$0xf] %v256_v15  ;;  %v286_v24 = vsub.f32 %v401_v19, %v402_v21  ;;  %v407_v26 = vld [vmem:[%s716_s0 + $0x3c] sm:$0xf] }
  0x1e   :  { %v405_v23 = vld [vmem:[%s717_s1 + $0x78] sm:$0xf]  ;;  %v408_v27 = vld [vmem:[%s717_s1 + $0x3c] sm:$0xf]  ;;  %400 = vst [vmem:[%s718_s2 + $0x74] sm:$0xf] %v276_v20 }
  0x1f   :  { %v296_v25 = vsub.f32 %v404_v22, %v405_v23  ;;  %v410_v28 = vld [vmem:[%s716_s0 + $0x7c] sm:$0xf]  ;;  %v306_v29 = vsub.f32 %v407_v26, %v408_v27  ;;  %403 = vst [vmem:[%s718_s2 + $0x38] sm:$0xf] %v286_v24 }
  0x20   :  { %v411_v30 = vld [vmem:[%s717_s1 + $0x7c] sm:$0xf] }
  0x21   :  { %406 = vst [vmem:[%s718_s2 + $0x78] sm:$0xf] %v296_v25  ;;  %v316_v31 = vsub.f32 %v410_v28, %v411_v30  ;;  %409 = vst [vmem:[%s718_s2 + $0x3c] sm:$0xf] %v306_v29 }
  0x23   :  { %412 = vst [vmem:[%s718_s2 + $0x7c] sm:$0xf] %v316_v31 }

// kernel: d_down_block.7
= control target key start
LH: loop header
LB: loop body
LE: loop exit
PB: predicated region body
PF: predicated region fallthrough
CT: control target
= control target key end

     0   :  { %s1050_s20 = smov 0   ;;  %s1254_s0 = inlined_call_operand.vmem [shape: f32[2,26,64], index: 0, kind: input, shape index: {}]   ;;  %s1255_s1 = inlined_call_operand.vmem [shape: f32[4,64,128], index: 1, kind: input, shape index: {}]   ;;  %s1256_s2 = inlined_call_operand.vmem [shape: f32[1,128], index: 2, kind: input, shape index: {}]   ;;  %s1257_s3 = inlined_call_operand.<no memory space> [shape: f32[1,1], index: 3, kind: input, shape index: {}]   ;;  %s1258_s4 = inlined_call_operand.vmem [shape: f32[2,20,128], index: 4, kind: input, shape index: {}]   ;;  %s1259_s5 = inlined_call_operand.vmem [shape: f32[2,20,128], index: 5, kind: output, shape index: {}]  }
   0x1   :  { %10 = sst [smem:[#allocation2]] %s1257_s3 }
   0x2 LB: > { %s753_s21 = sadd.s32 4294967295, %s1012_s20   ;;  %p757_p0 = scmp.ge.s32.totalorder %s1012_s20, 1  ;;  %s1012_s20 = sphi %s1050_s20, %s16_s20  }
   0x3   : > { %p198_p1 = scmp.lt.s32.totalorder %s1012_s20, 3 }
   0x5   : > { %p199_p2 = pnand %p757_p0, %p198_p1 }
   0x6   : > { %v762_v0 = vld [vmem:[%s1255_s1 + $0x40] sm:$0xff] (!%p199_p2)  ;;  %v763_v1 = vld [vmem:[%s1255_s1 + $0x48] sm:$0xff] (!%p199_p2)  ;;  %v1014_v3 = vmov (!%p199_p2), 0.0|0.0   ;;  %v764_v6 = vld [vmem:[%s1255_s1 + $0x50] sm:$0xff] (!%p199_p2)  ;;  %p1080_p3 = scmp.lt.s32.totalorder (!%p199_p2), %s753_s21, 1  ;;  %vm1015_vm0 = vmmov (!%p199_p2), 0  }
   0x7   : > { %202 = sbr.rel (%p199_p2) target bundleno = 272 (0x110), region = 40  ;;  %v249_v2 = vld [vmem:[%s1255_s1] sm:$0xff] (!%p199_p2)  ;;  %946 = vmatprep.subr.bf16.mxu0 (!%p199_p2), %v1014_v3  ;;  %v947_v4 = vpack.c.bf16 (!%p199_p2), %v763_v1, %v762_v0  ;;  %958 = vmatprep.subr.bf16.mxu1 (!%p199_p2), %v1014_v3  ;;  %v250_v5 = vld [vmem:[%s1255_s1 + $0x8] sm:$0xff] (!%p199_p2)  ;;  %v765_v7 = vld [vmem:[%s1255_s1 + $0x58] sm:$0xff] (!%p199_p2)  ;;  %v1016_v11 = vmov (!%p199_p2), 0.0   ;;  %vm269_vm1 = vcmask (!%p199_p2), 523264  }
   0x8   : > { %v959_v8 = vpack.c.bf16 (!%p199_p2), %v250_v5, %v249_v2  ;;  %v251_v9 = vld [vmem:[%s1255_s1 + $0x10] sm:$0xff] (!%p199_p2)  ;;  %v252_v10 = vld [vmem:[%s1255_s1 + $0x18] sm:$0xff] (!%p199_p2)  ;;  %862 = vmatprep.mubr.msk.f32.mxu0 (!%p199_p2), %vm1015_vm0, %v1016_v11  ;;  %887 = vmatprep.mubr.msk.f32.mxu1 (!%p199_p2), %vm1015_vm0, %v1016_v11  ;;  %v950_v12 = vpack.c.bf16 (!%p199_p2), %v765_v7, %v764_v6  ;;  %v766_v14 = vld [vmem:[%s1255_s1 + $0x60] sm:$0xff] (!%p199_p2) }
   0x9   : > { %948 = vmatpush3.bf16.msra.mxu0 (!%p199_p2), %v947_v4  ;;  %v962_v13 = vpack.c.bf16 (!%p199_p2), %v252_v10, %v251_v9  ;;  %v767_v15 = vld [vmem:[%s1255_s1 + $0x68] sm:$0xff] (!%p199_p2)  ;;  %v253_v16 = vld [vmem:[%s1255_s1 + $0x20] sm:$0xff] (!%p199_p2)  ;;  %v768_v20 = vld [vmem:[%s1255_s1 + $0x70] sm:$0xff] (!%p199_p2) }
   0xa   : > { %960 = vmatpush3.bf16.msra.mxu1 (!%p199_p2), %v959_v8  ;;  %949 = vmatprep.subr.bf16.mxu0 (!%p199_p2), %v1014_v3  ;;  %v254_v17 = vld [vmem:[%s1255_s1 + $0x28] sm:$0xff] (!%p199_p2)  ;;  %v953_v18 = vpack.c.bf16 (!%p199_p2), %v767_v15, %v766_v14  ;;  %v769_v21 = vld [vmem:[%s1255_s1 + $0x78] sm:$0xff] (!%p199_p2)  ;;  %v255_v22 = vld [vmem:[%s1255_s1 + $0x30] sm:$0xff] (!%p199_p2) }
   0xb   : > { %961 = vmatprep.subr.bf16.mxu1 (!%p199_p2), %v1014_v3  ;;  %v965_v19 = vpack.c.bf16 (!%p199_p2), %v254_v17, %v253_v16  ;;  %v256_v23 = vld [vmem:[%s1255_s1 + $0x38] sm:$0xff] (!%p199_p2)  ;;  %v956_v24 = vpack.c.bf16 (!%p199_p2), %v769_v21, %v768_v20  ;;  %v776_v26 = vld [vmem:[%s1255_s1 + $0x80] sm:$0xff] (!%p199_p2)  ;;  %v777_v27 = vld [vmem:[%s1255_s1 + $0x88] sm:$0xff] (!%p199_p2) }
   0xc   : > { %v968_v25 = vpack.c.bf16 (!%p199_p2), %v256_v23, %v255_v22  ;;  %v787_v28 = vld [vmem:[%s1255_s1 + $0xc0] sm:$0xff] (!%p199_p2)  ;;  %v788_v29 = vld [vmem:[%s1255_s1 + $0xc8] sm:$0xff] (!%p199_p2)  ;;  %v971_v31 = vpack.c.bf16 (!%p199_p2), %v777_v27, %v776_v26  ;;  %v778_v34 = vld [vmem:[%s1255_s1 + $0x90] sm:$0xff] (!%p199_p2) }
   0xd   : > { %951 = vmatpush3.bf16.msra.mxu0 (!%p199_p2), %v950_v12  ;;  %v983_v33 = vpack.c.bf16 (!%p199_p2), %v788_v29, %v787_v28  ;;  %v779_v35 = vld [vmem:[%s1255_s1 + $0x98] sm:$0xff] (!%p199_p2)  ;;  %v789_v36 = vld [vmem:[%s1255_s1 + $0xd0] sm:$0xff] (!%p199_p2)  ;;  %v780_v42 = vld [vmem:[%s1255_s1 + $0xa0] sm:$0xff] (!%p199_p2) }
   0xe   : > { %s1262_s21 = smov (!%p1080_p3, %s753_s21), 1  ;;  %963 = vmatpush3.bf16.msra.mxu1 %v962_v13  ;;  %952 = vmatprep.subr.bf16.mxu0 %v1014_v3  ;;  %v790_v37 = vld [vmem:[%s1255_s1 + $0xd8] sm:$0xff]  ;;  %v974_v38 = vpack.c.bf16 %v779_v35, %v778_v34  ;;  %v781_v43 = vld [vmem:[%s1255_s1 + $0xa8] sm:$0xff]  ;;  %v791_v44 = vld [vmem:[%s1255_s1 + $0xe0] sm:$0xff] }
   0xf   : > { %964 = vmatprep.subr.bf16.mxu1 %v1014_v3  ;;  %s801_s30 = sshll.u32 %s1262_s21, 5  ;;  %v986_v40 = vpack.c.bf16 %v790_v37, %v789_v36  ;;  %v792_v45 = vld [vmem:[%s1255_s1 + $0xe8] sm:$0xff]  ;;  %v977_v46 = vpack.c.bf16 %v781_v43, %v780_v42  ;;  %v782_v50 = vld [vmem:[%s1255_s1 + $0xb0] sm:$0xff]  ;;  %v783_v51 = vld [vmem:[%s1255_s1 + $0xb8] sm:$0xff]  ;;  %s994_s18 = smul.u32 24, %s1262_s21 }
  0x10   : > { %s1133_s8 = scalar_lea.vmem %s1254_s0, %s801_s30  ;;  %v989_v48 = vpack.c.bf16 %v792_v45, %v791_v44  ;;  %v793_v52 = vld [vmem:[%s1255_s1 + $0xf0] sm:$0xff]  ;;  %v794_v53 = vld [vmem:[%s1255_s1 + $0xf8] sm:$0xff]  ;;  %v980_v54 = vpack.c.bf16 %v783_v51, %v782_v50  ;;  %v798_v17 = vld [vmem:[%s1256_s2] ss:$0 sm:$0xff] }
  0x11   : > { %954 = vmatpush3.bf16.msra.mxu0 %v953_v18  ;;  %v257_v30 = vld [vmem:[%s1133_s8 + $0x1] sm:$0xff]  ;;  %v258_v39 = vld [vmem:[%s1133_s8 + $0x9] sm:$0xff]  ;;  %v259_v47 = vld [vmem:[%s1133_s8 + $0x11] sm:$0xf]  ;;  %v992_v55 = vpack.c.bf16 %v794_v53, %v793_v52  ;;  %s1243_s24 = scalar_lea.vmem %s1258_s4, %s994_s18  ;;  %s245_s26 = scalar_lea.vmem %s1259_s5, %s994_s18 }
  0x12   : > { %966 = vmatpush3.bf16.msra.mxu1 %v965_v19  ;;  %955 = vmatprep.subr.bf16.mxu0 %v1014_v3  ;;  %v246_v32 = vld [vmem:[%s1133_s8] sm:$0xff]  ;;  %v247_v41 = vld [vmem:[%s1133_s8 + $0x8] sm:$0xff]  ;;  %v248_v49 = vld [vmem:[%s1133_s8 + $0x10] sm:$0xf] }
  0x13   : > { %967 = vmatprep.subr.bf16.mxu1 %v1014_v3  ;;  %v448_v56 = vld [vmem:[%s1133_s8 + $0x5] sm:$0xff]  ;;  %v449_v58 = vld [vmem:[%s1133_s8 + $0xd] sm:$0xff]  ;;  %v450_v60 = vld [vmem:[%s1133_s8 + $0x15] sm:$0xf] }
  0x14   : > { %v552_v57 = vld [vmem:[%s1133_s8 + $0x6] sm:$0xff]  ;;  %v553_v59 = vld [vmem:[%s1133_s8 + $0xe] sm:$0xff]  ;;  %v554_v61 = vld [vmem:[%s1133_s8 + $0x16] sm:$0xf]  ;;  %s666_s8 = sld [smem:[#allocation2]] }
  0x15   : > { %957 = vmatpush3.bf16.msra.mxu0 %v956_v24  ;;  %v677_v28 = vld [vmem:[%s1243_s24] sm:$0xff]  ;;  %v679_v45 = vld [vmem:[%s1243_s24 + $0x10] sm:$0xf] }
  0x16   : > { %969 = vmatpush3.bf16.msra.mxu1 %v968_v25  ;;  %970 = vmatprep.subr.bf16.mxu0 %v1014_v3 }
  0x17   : > { %982 = vmatprep.subr.bf16.mxu1 %v1014_v3 }
  0x18   : > { %863 = vmatmul.mubr.msk.f32.vlgmr.msra.gmra.mrb[0].mxu0 %vm269_vm1, %v257_v30 }
  0x19   : > { %888 = vmatmul.mubr.msk.f32.vlgmr.msra.gmra.mrb[0].mxu1 %vm269_vm1, %v246_v32  ;;  %972 = vmatpush3.bf16.msra.mxu0 %v971_v31 }
  0x1a   : > { %984 = vmatpush3.bf16.msra.mxu1 %v983_v33  ;;  %973 = vmatprep.subr.bf16.mxu0 %v1014_v3  ;;  %v670_v20 = vstv %s666_s8 }
  0x1b   : > { %985 = vmatprep.subr.bf16.mxu1 %v1014_v3  ;;  %865 = vmatprep.mubr.msk.f32.mxu0 %vm1015_vm0, %v1016_v11 }
  0x1c   : > { %866 = vmatmul.mubr.msk.f32.gmra.mrb[2].mxu0 %vm269_vm1, %v258_v39  ;;  %890 = vmatprep.mubr.msk.f32.mxu1 %vm1015_vm0, %v1016_v11  ;;  %v678_v39 = vld [vmem:[%s1243_s24 + $0x8] sm:$0xff] }
  0x1d   : > { %975 = vmatpush3.bf16.msra.mxu0 %v974_v38  ;;  %891 = vmatmul.mubr.msk.f32.gmra.mrb[2].mxu1 %vm269_vm1, %v247_v41 }
  0x1e   : > { %987 = vmatpush3.bf16.msra.mxu1 %v986_v40  ;;  %976 = vmatprep.subr.bf16.mxu0 %v1014_v3 }
  0x1f   : > { %988 = vmatprep.subr.bf16.mxu1 %v1014_v3  ;;  %868 = vmatprep.mubr.msk.f32.mxu0 %vm1015_vm0, %v1016_v11 }
  0x20   : > { %869 = vmatmul.mubr.msk.f32.gmra.mrb[4].mxu0 %vm269_vm1, %v259_v47  ;;  %893 = vmatprep.mubr.msk.f32.mxu1 %vm1015_vm0, %v1016_v11 }
  0x21   : > { %978 = vmatpush3.bf16.msra.mxu0 %v977_v46  ;;  %894 = vmatmul.mubr.msk.f32.gmra.mrb[4].mxu1 %vm269_vm1, %v248_v49 }
  0x22   : > { %990 = vmatpush3.bf16.msra.mxu1 %v989_v48  ;;  %979 = vmatprep.subr.bf16.mxu0 %v1014_v3 }
  0x23   : > { %991 = vmatprep.subr.bf16.mxu1 %v1014_v3  ;;  %912 = vmatprep.mubr.msk.f32.mxu0 %vm1015_vm0, %v1016_v11 }
  0x24   : > { %937 = vmatprep.mubr.msk.f32.mxu1 %vm1015_vm0, %v1016_v11 }
  0x25   : > { %981 = vmatpush3.bf16.msra.mxu0 %v980_v54 }
  0x26   : > { %993 = vmatpush3.bf16.msra.mxu1 %v992_v55 }
  0x28   : > { %913 = vmatmul.mubr.msk.f32.vlgmr.msra.gmra.mrb[6].mxu0 %vm269_vm1, %v448_v56 }
  0x29   : > { %938 = vmatmul.mubr.msk.f32.vlgmr.msra.gmra.mrb[6].mxu1 %vm269_vm1, %v552_v57  ;;  %915 = vmatprep.mubr.msk.f32.mxu0 %vm1015_vm0, %v1016_v11 }
  0x2a   : > { %940 = vmatprep.mubr.msk.f32.mxu1 %vm1015_vm0, %v1016_v11 }
  0x2c   : > { %916 = vmatmul.mubr.msk.f32.gmra.mrb[8].mxu0 %vm269_vm1, %v449_v58 }
  0x2d   : > { %941 = vmatmul.mubr.msk.f32.gmra.mrb[8].mxu1 %vm269_vm1, %v553_v59  ;;  %918 = vmatprep.mubr.msk.f32.mxu0 %vm1015_vm0, %v1016_v11 }
  0x2e   : > { %943 = vmatprep.mubr.msk.f32.mxu1 %vm1015_vm0, %v1016_v11 }
  0x30   : > { %919 = vmatmul.mubr.msk.f32.gmra.mrb[10].mxu0 %vm269_vm1, %v450_v60 }
  0x31   : > { %944 = vmatmul.mubr.msk.f32.gmra.mrb[10].mxu1 %vm269_vm1, %v554_v61 }
  0xeb   : > { %v345_v62 = vpop.f32.mrb[0].mxu0 }
  0xec   : > { %v864_v63 = vpop.f32.mrb[1].mxu0  ;;  %v434_v0 = vpop.f32.mrb[0].mxu1 }
  0xed   : > { %v435_v1 = vadd.f32 %v434_v0, %v345_v62  ;;  %v889_v2 = vpop.f32.mrb[1].mxu1 }
  0xef   : > { %v350_v3 = vpop.f32.mrb[2].mxu0 }
  0xf0   : > { %v867_v4 = vpop.f32.mrb[3].mxu0  ;;  %v439_v5 = vpop.f32.mrb[2].mxu1 }
  0xf1   : > { %v440_v6 = vadd.f32 %v439_v5, %v350_v3  ;;  %v892_v7 = vpop.f32.mrb[3].mxu1 }
  0xf3   : > { %v355_v8 = vpop.f32.mrb[4].mxu0 }
  0xf4   : > { %v870_v9 = vpop.f32.mrb[5].mxu0  ;;  %v444_v10 = vpop.f32.mrb[4].mxu1 }
  0xf5   : > { %v445_v11 = vadd.f32 %v444_v10, %v355_v8  ;;  %v895_v12 = vpop.f32.mrb[5].mxu1 }
  0xfb   : > { %v535_v13 = vpop.f32.mrb[6].mxu0 }
  0xfc   : > { %v549_v14 = vadd.f32 %v535_v13, %v435_v1  ;;  %v914_v15 = vpop.f32.mrb[7].mxu0  ;;  %v639_v16 = vpop.f32.mrb[6].mxu1 }
  0xfd   : > { %v939_v18 = vpop.f32.mrb[7].mxu1 }
  0xfe   : > { %v653_v19 = vadd.f32 %v639_v16, %v549_v14 }
  0xff   : > { %v540_v21 = vpop.f32.mrb[8].mxu0 }
 0x100   : > { %v663_v22 = vadd.f32 %v798_v17, %v653_v19  ;;  %v550_v23 = vadd.f32 %v540_v21, %v440_v6  ;;  %v917_v24 = vpop.f32.mrb[9].mxu0  ;;  %v644_v25 = vpop.f32.mrb[8].mxu1 }
 0x101   : > { %v942_v26 = vpop.f32.mrb[9].mxu1 }
 0x102   : > { %vm667_vm2 = vcmp.gt.f32.partialorder %v663_v22, 0.0  ;;  %v671_v27 = vmul.f32 %v670_v20, %v663_v22  ;;  %v654_v29 = vadd.f32 %v644_v25, %v550_v23 }
 0x103   : > { %v545_v30 = vpop.f32.mrb[10].mxu0 }
 0x104   : > { %v674_v31 = vsel %vm667_vm2, %v663_v22, %v671_v27  ;;  %v664_v32 = vadd.f32 %v798_v17, %v654_v29  ;;  %v551_v33 = vadd.f32 %v545_v30, %v445_v11  ;;  %v920_v34 = vpop.f32.mrb[11].mxu0  ;;  %v649_v35 = vpop.f32.mrb[10].mxu1 }
 0x105   : > { %v680_v36 = vadd.f32 %v677_v28, %v674_v31  ;;  %v945_v37 = vpop.f32.mrb[11].mxu1 }
 0x106   : > { %vm668_vm3 = vcmp.gt.f32.partialorder %v664_v32, 0.0  ;;  %v672_v38 = vmul.f32 %v670_v20, %v664_v32  ;;  %v655_v40 = vadd.f32 %v649_v35, %v551_v33 }
 0x107   : > { %683 = vst [vmem:[%s245_s26] sm:$0xff] %v680_v36 }
 0x108   : > { %v675_v41 = vsel %vm668_vm3, %v664_v32, %v672_v38  ;;  %v665_v42 = vadd.f32 %v798_v17, %v655_v40 }
 0x109   : > { %v681_v43 = vadd.f32 %v678_v39, %v675_v41 }
 0x10a   : > { %vm669_vm4 = vcmp.gt.f32.partialorder %v665_v42, 0.0  ;;  %v673_v44 = vmul.f32 %v670_v20, %v665_v42 }
 0x10b   : > { %684 = vst [vmem:[%s245_s26 + $0x8] sm:$0xff] %v681_v43 }
 0x10c   : > { %v676_v46 = vsel %vm669_vm4, %v665_v42, %v673_v44 }
 0x10d   : > { %v682_v47 = vadd.f32 %v679_v45, %v676_v46 }
 0x10f   : > { %685 = vst [vmem:[%s245_s26 + $0x10] sm:$0xf] %v682_v47 }
 0x110 PF: > { %s16_s20 = sadd.s32 1, %s1012_s20  }
 0x111   : > { %p13_p4 = scmp.ge.s32.totalorder %s16_s20, 4  }
 0x113   :  { %15 = sbr.rel (!%p13_p4) target bundleno = 2 (0x2), region = 76 }

</bundles_post_ra>
